<compile_context>
chip_gen: v7x
topology: tpu7x:2x2x1
jax: 0.10.0
libtpu: 0.0.40
codegen_flags: <defaults>
</compile_context>

<pallas_src>
from functools import partial

import jax
import jax.numpy as jnp
from jax.experimental import pallas as pl
from jax.experimental.pallas import tpu as pltpu


# ----------------------------------------------------------------------------
# Fused kernel: resnet (3 convs) + gated-attention MIL pooling + Cox risk head
# Processes BB whole bags per grid step; rows are flattened to (BB*L, channels).
# ----------------------------------------------------------------------------
def cox_attention_resnet_kernel(
        # inputs
        x_ref, pos_ref, mask_ref,
        ws_ref, bs_ref, w1_ref, b1_ref, w2_ref, b2_ref,
        wv_ref, bv_ref, wu_ref, bu_ref, ww_ref, wr_ref, br_ref,
        # outputs
        risk_ref, attn_ref,
        *, BB, L, K_stem, K_res):

    rows = BB * L
    pos = pos_ref[...]                                # (rows, 1) f32 within-bag index

    def im2col(src, K):
        # (rows, C) f32 -> (rows, K*C) bf16 "same"-padded im2col slab, built as a
        # value: XLU sublane roll per tap + halo mask (zero padding AND removal of
        # cross-bag leakage from the circular roll). No scratch, no masked stores.
        pad = (K - 1) // 2
        taps = []
        for k in range(K):
            d = k - pad
            t = src if d == 0 else pltpu.roll(src, (-d) % rows, 0)
            lo, hi = max(0, -d), min(L, L - d)
            if lo > 0 or hi < L:
                valid = (pos >= jnp.float32(lo)) & (pos < jnp.float32(hi))
                t = jnp.where(valid, t, 0.0)
            taps.append(t.astype(jnp.bfloat16))
        return jnp.concatenate(taps, axis=-1)

    def conv_bn_relu(src, w_ref, b_ref, K, skip=None):
        # ONE MXU matmul per conv: (rows, K*C) @ (K*C, F); eval-BN folded into w/b.
        cols = im2col(src, K)
        y = jnp.dot(cols, w_ref[...], preferred_element_type=jnp.float32)
        y = y + b_ref[...]                            # (1, F) broadcast bias
        if skip is not None:
            y = y + skip                              # residual add
        return jnp.maximum(y, 0.0)

    # --- LocalActivationResNet: stem conv + one residual block (vreg/VMEM resident) ---
    x = x_ref[...]                                                    # (rows, Cin) f32
    h = conv_bn_relu(x, ws_ref, bs_ref, K_stem)                       # (rows, F)
    h1 = conv_bn_relu(h, w1_ref, b1_ref, K_res)                       # (rows, F)
    feat = conv_bn_relu(h1, w2_ref, b2_ref, K_res, skip=h)            # (rows, F)
    # feat == PyTorch resnet(x).transpose(-2, -1), flattened over (bag, instance)

    # --- gated attention: a = w^T (tanh(V h) * sigmoid(U h)) ---
    fb = feat.astype(jnp.bfloat16)
    av = jnp.tanh(jnp.dot(fb, wv_ref[...], preferred_element_type=jnp.float32)
                  + bv_ref[...])                                      # (rows, H) f32
    au = jax.nn.sigmoid(jnp.dot(fb, wu_ref[...], preferred_element_type=jnp.float32)
                        + bu_ref[...])                                # (rows, H) f32
    gated = av * au                                                   # (rows, H) f32

    # logits and per-instance risk contributions via VPU multiply + lane reduce.
    # Attention-logit bias dropped: softmax is shift-invariant, logits not output.
    gated3 = gated.reshape(BB, L, gated.shape[-1])
    feat3 = feat.reshape(BB, L, feat.shape[-1])
    logits = jnp.sum(gated3 * ww_ref[...], axis=-1)                   # (BB, L)
    s = jnp.sum(feat3 * wr_ref[...], axis=-1)                         # (BB, L) feat.wr

    # --- masked softmax over instances (lane axis), NaN-safe for empty bags ---
    mask = mask_ref[...]                                              # (BB, L)
    ml = jnp.where(mask > 0, logits, jnp.float32(-1e30))
    m = jnp.max(ml, axis=-1, keepdims=True)                           # (BB, 1)
    e = jnp.exp(ml - m) * mask
    denom = jnp.maximum(jnp.sum(e, axis=-1, keepdims=True), jnp.float32(1e-30))
    attn = e * pl.reciprocal(denom, approx=True)                      # (BB, L); masked==0
    attn_ref[...] = attn.astype(attn_ref.dtype)

    # --- Cox risk head: wr . (sum_l attn_l feat_l) + br == sum_l attn_l * s_l + br ---
    risk = jnp.sum(attn * s, axis=-1, keepdims=True) + br_ref[...]    # (BB, 1)
    risk_ref[...] = risk.astype(risk_ref.dtype)


# ----------------------------------------------------------------------------
# Wrapper: layout flattening, eval-mode BN folding, param plumbing
# ----------------------------------------------------------------------------
def _fold_bn_into_conv(w, scale, shift):
    """w: (K, Cin, Cout); scale/shift: (Cout,) folded eval-mode BN -> bf16 matmul slab."""
    K, Cin, Cout = w.shape
    w_col = (w * scale[None, None, :]).reshape(K * Cin, Cout).astype(jnp.bfloat16)
    bias = shift.reshape(1, Cout).astype(jnp.float32)
    return w_col, bias


@partial(jax.jit, static_argnames=("bags_per_block",))
def cox_attention_resnet(x_ncl, mask, p, *, bags_per_block=None):
    """x_ncl: (B, Cin, L) PyTorch NCL layout. mask: (B, L). -> (risk (B,1), attn (B,L))."""
    B, Cin, L = x_ncl.shape
    BB = B if bags_per_block is None else bags_per_block
    assert B % BB == 0, "bags_per_block must divide the batch"

    # flatten bags into the matmul M dimension: (B, Cin, L) -> (B*L, Cin)
    x = jnp.transpose(x_ncl, (0, 2, 1)).reshape(B * L, Cin).astype(jnp.float32)
    # within-bag position of each flattened row (for the conv halo mask)
    pos = jnp.tile(jnp.arange(L, dtype=jnp.float32), B).reshape(B * L, 1)

    K_stem = p['stem_w'].shape[0]
    K_res = p['c1_w'].shape[0]
    F = p['stem_w'].shape[2]
    H = p['wv'].shape[1]
    assert (K_stem - 1) // 2 < L and (K_res - 1) // 2 < L

    ws, bs = _fold_bn_into_conv(p['stem_w'], p['stem_s'], p['stem_b'])
    w1, b1 = _fold_bn_into_conv(p['c1_w'], p['c1_s'], p['c1_b'])
    w2, b2 = _fold_bn_into_conv(p['c2_w'], p['c2_s'], p['c2_b'])

    def rep(shape):
        # small weight: full array, replicated across the bag grid
        return pl.BlockSpec(shape, lambda i, _z=(0,) * len(shape): _z)

    kern = partial(cox_attention_resnet_kernel, BB=BB, L=L,
                   K_stem=K_stem, K_res=K_res)

    risk, attn = pl.pallas_call(
        kern,
        grid=(B // BB,),
        out_shape=(jax.ShapeDtypeStruct((B, 1), jnp.float32),
                   jax.ShapeDtypeStruct((B, L), jnp.float32)),
        in_specs=[
            pl.BlockSpec((BB * L, Cin), lambda i: (i, 0)),   # x (flattened rows)
            pl.BlockSpec((BB * L, 1), lambda i: (i, 0)),     # within-bag positions
            pl.BlockSpec((BB, L), lambda i: (i, 0)),         # instance mask
            rep(ws.shape), rep(bs.shape),                    # stem conv
            rep(w1.shape), rep(b1.shape),                    # res conv 1
            rep(w2.shape), rep(b2.shape),                    # res conv 2
            rep((F, H)), rep((1, H)),                        # wv, bv
            rep((F, H)), rep((1, H)),                        # wu, bu
            rep((1, H)), rep((1, F)),                        # ww, wr
            rep((1, 1)),                                     # br
        ],
        out_specs=(pl.BlockSpec((BB, 1), lambda i: (i, 0)),
                   pl.BlockSpec((BB, L), lambda i: (i, 0))),
        compiler_params=pltpu.CompilerParams(
            dimension_semantics=("parallel",)),              # v7x: 2 TCs split bags
    )(x, pos, mask.astype(jnp.float32),
      ws, bs, w1, b1, w2, b2,
      p['wv'].astype(jnp.bfloat16), p['bv'].reshape(1, H).astype(jnp.float32),
      p['wu'].astype(jnp.bfloat16), p['bu'].reshape(1, H).astype(jnp.float32),
      p['ww'].reshape(1, H).astype(jnp.float32),
      p['wr'].reshape(1, F).astype(jnp.float32),
      p['br'].reshape(1, 1).astype(jnp.float32))
    return risk, attn


def init_params(key, cin, feat, hidden):
    ks = jax.random.split(key, 12)
    n = lambda k, shape, s=0.1: (s * jax.random.normal(k, shape)).astype(jnp.float32)
    # BN folded for eval mode (running mean=0, var=1): scale = gamma, shift = beta
    return {
        'stem_w': n(ks[0], (7, cin, feat)),
        'stem_s': jnp.ones((feat,), jnp.float32),
        'stem_b': jnp.zeros((feat,), jnp.float32),
        'c1_w': n(ks[1], (3, feat, feat)),
        'c1_s': jnp.ones((feat,), jnp.float32),
        'c1_b': jnp.zeros((feat,), jnp.float32),
        'c2_w': n(ks[2], (3, feat, feat)),
        'c2_s': jnp.ones((feat,), jnp.float32),
        'c2_b': jnp.zeros((feat,), jnp.float32),
        'wv': n(ks[3], (feat, hidden)),
        'bv': n(ks[4], (hidden,), 0.01),
        'wu': n(ks[5], (feat, hidden)),
        'bu': n(ks[6], (hidden,), 0.01),
        'ww': n(ks[7], (hidden, 1)),
        'wr': n(ks[8], (feat, 1)),
        'br': n(ks[9], (1, 1), 0.01),
    }


if __name__ == "__main__":
    key = jax.random.PRNGKey(0)
    k_x, k_p = jax.random.split(key)

    B, Cin, L = 2, 4, 16          # small shapes consistent with the module
    FEAT, HIDDEN = 32, 16

    x = jax.random.normal(k_x, (B, Cin, L), jnp.float32)       # PyTorch NCL input
    mask = jnp.ones((B, L), jnp.float32).at[1, 12:].set(0.0)   # pad tail of bag 1

    params = init_params(k_p, Cin, FEAT, HIDDEN)

    risk, attention_weights = cox_attention_resnet(x, mask, params)
    jax.block_until_ready((risk, attention_weights))

    assert risk.shape == (B, 1)
    assert attention_weights.shape == (B, L)
    # attention over valid positions sums to ~1 (approx-reciprocal normalization),
    # masked positions are exactly 0
    assert bool(jnp.all(attention_weights[1, 12:] == 0.0))
    assert bool(jnp.allclose(attention_weights.sum(-1), 1.0, atol=1e-2))
    assert bool(jnp.all(jnp.isfinite(risk)))

    print("KERNEL_OK")
</pallas_src>

<mosaic_0001>
module attributes {stable_mosaic.version = 11 : i64} {
  func.func @cox_attention_resnet_kernel(%arg0: i32, %arg1: memref<32x4xf32, #tpu.memory_space<vmem>>, %arg2: memref<32x1xf32, #tpu.memory_space<vmem>>, %arg3: memref<2x16xf32, #tpu.memory_space<vmem>>, %arg4: memref<28x32xbf16, #tpu.memory_space<vmem>>, %arg5: memref<1x32xf32, #tpu.memory_space<vmem>>, %arg6: memref<96x32xbf16, #tpu.memory_space<vmem>>, %arg7: memref<1x32xf32, #tpu.memory_space<vmem>>, %arg8: memref<96x32xbf16, #tpu.memory_space<vmem>>, %arg9: memref<1x32xf32, #tpu.memory_space<vmem>>, %arg10: memref<32x16xbf16, #tpu.memory_space<vmem>>, %arg11: memref<1x16xf32, #tpu.memory_space<vmem>>, %arg12: memref<32x16xbf16, #tpu.memory_space<vmem>>, %arg13: memref<1x16xf32, #tpu.memory_space<vmem>>, %arg14: memref<1x16xf32, #tpu.memory_space<vmem>>, %arg15: memref<1x32xf32, #tpu.memory_space<vmem>>, %arg16: memref<1x1xf32, #tpu.memory_space<vmem>>, %arg17: memref<2x1xf32, #tpu.memory_space<vmem>>, %arg18: memref<2x16xf32, #tpu.memory_space<vmem>>) attributes {dimension_semantics = [#tpu.dimension_semantics<parallel>], iteration_bounds = array<i64: 1>, scalar_prefetch = 0 : i64, scratch_operands = 0 : i64, tpu.core_type = #tpu.core_type<tc>, window_params = [{transform_indices = @transform_0, window_bounds = array<i64: 32, 4>}, {transform_indices = @transform_1, window_bounds = array<i64: 32, 1>}, {transform_indices = @transform_2, window_bounds = array<i64: 2, 16>}, {pipeline_mode = #tpu.pipeline_mode<synchronous>, transform_indices = @transform_3, window_bounds = array<i64: 28, 32>}, {pipeline_mode = #tpu.pipeline_mode<synchronous>, transform_indices = @transform_4, window_bounds = array<i64: 1, 32>}, {pipeline_mode = #tpu.pipeline_mode<synchronous>, transform_indices = @transform_5, window_bounds = array<i64: 96, 32>}, {pipeline_mode = #tpu.pipeline_mode<synchronous>, transform_indices = @transform_6, window_bounds = array<i64: 1, 32>}, {pipeline_mode = #tpu.pipeline_mode<synchronous>, transform_indices = @transform_7, window_bounds = array<i64: 96, 32>}, {pipeline_mode = #tpu.pipeline_mode<synchronous>, transform_indices = @transform_8, window_bounds = array<i64: 1, 32>}, {pipeline_mode = #tpu.pipeline_mode<synchronous>, transform_indices = @transform_9, window_bounds = array<i64: 32, 16>}, {pipeline_mode = #tpu.pipeline_mode<synchronous>, transform_indices = @transform_10, window_bounds = array<i64: 1, 16>}, {pipeline_mode = #tpu.pipeline_mode<synchronous>, transform_indices = @transform_11, window_bounds = array<i64: 32, 16>}, {pipeline_mode = #tpu.pipeline_mode<synchronous>, transform_indices = @transform_12, window_bounds = array<i64: 1, 16>}, {pipeline_mode = #tpu.pipeline_mode<synchronous>, transform_indices = @transform_13, window_bounds = array<i64: 1, 16>}, {pipeline_mode = #tpu.pipeline_mode<synchronous>, transform_indices = @transform_14, window_bounds = array<i64: 1, 32>}, {pipeline_mode = #tpu.pipeline_mode<synchronous>, transform_indices = @transform_15, window_bounds = array<i64: 1, 1>}, {transform_indices = @transform_16, window_bounds = array<i64: 2, 1>}, {transform_indices = @transform_17, window_bounds = array<i64: 2, 16>}]} {
    %c0 = arith.constant 0 : index
    %c0_0 = arith.constant 0 : index
    %0 = vector.load %arg2[%c0, %c0_0] : memref<32x1xf32, #tpu.memory_space<vmem>>, vector<32x1xf32>
    %c0_1 = arith.constant 0 : index
    %c0_2 = arith.constant 0 : index
    %1 = vector.load %arg1[%c0_1, %c0_2] : memref<32x4xf32, #tpu.memory_space<vmem>>, vector<32x4xf32>
    %c3_i32 = arith.constant 3 : i32
    %2 = tpu.dynamic_rotate %1 by %c3_i32 dim 0 : vector<32x4xf32>, i32 -> vector<32x4xf32>
    %cst = arith.constant 3.000000e+00 : f32
    %3 = vector.broadcast %cst : f32 to vector<32x1xf32>
    %4 = arith.cmpf oge, %0, %3 : vector<32x1xf32>
    %cst_3 = arith.constant 1.600000e+01 : f32
    %5 = vector.broadcast %cst_3 : f32 to vector<32x1xf32>
    %6 = arith.cmpf olt, %0, %5 : vector<32x1xf32>
    %7 = arith.andi %4, %6 : vector<32x1xi1>
    %cst_4 = arith.constant 0.000000e+00 : f32
    %8 = vector.shape_cast %7 : vector<32x1xi1> to vector<32x1xi1>
    %9 = vector.broadcast %8 : vector<32x1xi1> to vector<32x4xi1>
    %10 = vector.broadcast %cst_4 : f32 to vector<32x4xf32>
    %11 = arith.select %9, %2, %10 : vector<32x4xi1>, vector<32x4xf32>
    %12 = arith.truncf %11 : vector<32x4xf32> to vector<32x4xbf16>
    %c2_i32 = arith.constant 2 : i32
    %13 = tpu.dynamic_rotate %1 by %c2_i32 dim 0 : vector<32x4xf32>, i32 -> vector<32x4xf32>
    %cst_5 = arith.constant 2.000000e+00 : f32
    %14 = vector.broadcast %cst_5 : f32 to vector<32x1xf32>
    %15 = arith.cmpf oge, %0, %14 : vector<32x1xf32>
    %cst_6 = arith.constant 1.600000e+01 : f32
    %16 = vector.broadcast %cst_6 : f32 to vector<32x1xf32>
    %17 = arith.cmpf olt, %0, %16 : vector<32x1xf32>
    %18 = arith.andi %15, %17 : vector<32x1xi1>
    %cst_7 = arith.constant 0.000000e+00 : f32
    %19 = vector.shape_cast %18 : vector<32x1xi1> to vector<32x1xi1>
    %20 = vector.broadcast %19 : vector<32x1xi1> to vector<32x4xi1>
    %21 = vector.broadcast %cst_7 : f32 to vector<32x4xf32>
    %22 = arith.select %20, %13, %21 : vector<32x4xi1>, vector<32x4xf32>
    %23 = arith.truncf %22 : vector<32x4xf32> to vector<32x4xbf16>
    %c1_i32 = arith.constant 1 : i32
    %24 = tpu.dynamic_rotate %1 by %c1_i32 dim 0 : vector<32x4xf32>, i32 -> vector<32x4xf32>
    %cst_8 = arith.constant 1.000000e+00 : f32
    %25 = vector.broadcast %cst_8 : f32 to vector<32x1xf32>
    %26 = arith.cmpf oge, %0, %25 : vector<32x1xf32>
    %cst_9 = arith.constant 1.600000e+01 : f32
    %27 = vector.broadcast %cst_9 : f32 to vector<32x1xf32>
    %28 = arith.cmpf olt, %0, %27 : vector<32x1xf32>
    %29 = arith.andi %26, %28 : vector<32x1xi1>
    %cst_10 = arith.constant 0.000000e+00 : f32
    %30 = vector.shape_cast %29 : vector<32x1xi1> to vector<32x1xi1>
    %31 = vector.broadcast %30 : vector<32x1xi1> to vector<32x4xi1>
    %32 = vector.broadcast %cst_10 : f32 to vector<32x4xf32>
    %33 = arith.select %31, %24, %32 : vector<32x4xi1>, vector<32x4xf32>
    %34 = arith.truncf %33 : vector<32x4xf32> to vector<32x4xbf16>
    %35 = arith.truncf %1 : vector<32x4xf32> to vector<32x4xbf16>
    %c31_i32 = arith.constant 31 : i32
    %36 = tpu.dynamic_rotate %1 by %c31_i32 dim 0 : vector<32x4xf32>, i32 -> vector<32x4xf32>
    %cst_11 = arith.constant 0.000000e+00 : f32
    %37 = vector.broadcast %cst_11 : f32 to vector<32x1xf32>
    %38 = arith.cmpf oge, %0, %37 : vector<32x1xf32>
    %cst_12 = arith.constant 1.500000e+01 : f32
    %39 = vector.broadcast %cst_12 : f32 to vector<32x1xf32>
    %40 = arith.cmpf olt, %0, %39 : vector<32x1xf32>
    %41 = arith.andi %38, %40 : vector<32x1xi1>
    %cst_13 = arith.constant 0.000000e+00 : f32
    %42 = vector.shape_cast %41 : vector<32x1xi1> to vector<32x1xi1>
    %43 = vector.broadcast %42 : vector<32x1xi1> to vector<32x4xi1>
    %44 = vector.broadcast %cst_13 : f32 to vector<32x4xf32>
    %45 = arith.select %43, %36, %44 : vector<32x4xi1>, vector<32x4xf32>
    %46 = arith.truncf %45 : vector<32x4xf32> to vector<32x4xbf16>
    %c30_i32 = arith.constant 30 : i32
    %47 = tpu.dynamic_rotate %1 by %c30_i32 dim 0 : vector<32x4xf32>, i32 -> vector<32x4xf32>
    %cst_14 = arith.constant 0.000000e+00 : f32
    %48 = vector.broadcast %cst_14 : f32 to vector<32x1xf32>
    %49 = arith.cmpf oge, %0, %48 : vector<32x1xf32>
    %cst_15 = arith.constant 1.400000e+01 : f32
    %50 = vector.broadcast %cst_15 : f32 to vector<32x1xf32>
    %51 = arith.cmpf olt, %0, %50 : vector<32x1xf32>
    %52 = arith.andi %49, %51 : vector<32x1xi1>
    %cst_16 = arith.constant 0.000000e+00 : f32
    %53 = vector.shape_cast %52 : vector<32x1xi1> to vector<32x1xi1>
    %54 = vector.broadcast %53 : vector<32x1xi1> to vector<32x4xi1>
    %55 = vector.broadcast %cst_16 : f32 to vector<32x4xf32>
    %56 = arith.select %54, %47, %55 : vector<32x4xi1>, vector<32x4xf32>
    %57 = arith.truncf %56 : vector<32x4xf32> to vector<32x4xbf16>
    %c29_i32 = arith.constant 29 : i32
    %58 = tpu.dynamic_rotate %1 by %c29_i32 dim 0 : vector<32x4xf32>, i32 -> vector<32x4xf32>
    %cst_17 = arith.constant 0.000000e+00 : f32
    %59 = vector.broadcast %cst_17 : f32 to vector<32x1xf32>
    %60 = arith.cmpf oge, %0, %59 : vector<32x1xf32>
    %cst_18 = arith.constant 1.300000e+01 : f32
    %61 = vector.broadcast %cst_18 : f32 to vector<32x1xf32>
    %62 = arith.cmpf olt, %0, %61 : vector<32x1xf32>
    %63 = arith.andi %60, %62 : vector<32x1xi1>
    %cst_19 = arith.constant 0.000000e+00 : f32
    %64 = vector.shape_cast %63 : vector<32x1xi1> to vector<32x1xi1>
    %65 = vector.broadcast %64 : vector<32x1xi1> to vector<32x4xi1>
    %66 = vector.broadcast %cst_19 : f32 to vector<32x4xf32>
    %67 = arith.select %65, %58, %66 : vector<32x4xi1>, vector<32x4xf32>
    %68 = arith.truncf %67 : vector<32x4xf32> to vector<32x4xbf16>
    %69 = tpu.concatenate %12, %23, %34, %35, %46, %57, %68 in 1 : vector<32x4xbf16>, vector<32x4xbf16>, vector<32x4xbf16>, vector<32x4xbf16>, vector<32x4xbf16>, vector<32x4xbf16>, vector<32x4xbf16> -> vector<32x28xbf16>
    %c0_20 = arith.constant 0 : index
    %c0_21 = arith.constant 0 : index
    %70 = vector.load %arg4[%c0_20, %c0_21] : memref<28x32xbf16, #tpu.memory_space<vmem>>, vector<28x32xbf16>
    %cst_22 = arith.constant dense<0.000000e+00> : vector<32x32xf32>
    %71 = tpu.matmul %69, %70, %cst_22 {dimension_numbers = #tpu.dot_dimension_numbers<[1], [0], [0], [1], [0, 0, 1, 1], [], []>} : vector<32x28xbf16>, vector<28x32xbf16>, vector<32x32xf32> -> vector<32x32xf32>
    %c0_23 = arith.constant 0 : index
    %c0_24 = arith.constant 0 : index
    %72 = vector.load %arg5[%c0_23, %c0_24] : memref<1x32xf32, #tpu.memory_space<vmem>>, vector<1x32xf32>
    %73 = vector.broadcast %72 : vector<1x32xf32> to vector<32x32xf32>
    %74 = arith.addf %71, %73 : vector<32x32xf32>
    %cst_25 = arith.constant 0.000000e+00 : f32
    %75 = vector.broadcast %cst_25 : f32 to vector<32x32xf32>
    %76 = arith.maximumf %74, %75 : vector<32x32xf32>
    %c1_i32_26 = arith.constant 1 : i32
    %77 = tpu.dynamic_rotate %76 by %c1_i32_26 dim 0 : vector<32x32xf32>, i32 -> vector<32x32xf32>
    %cst_27 = arith.constant 1.000000e+00 : f32
    %78 = vector.broadcast %cst_27 : f32 to vector<32x1xf32>
    %79 = arith.cmpf oge, %0, %78 : vector<32x1xf32>
    %cst_28 = arith.constant 1.600000e+01 : f32
    %80 = vector.broadcast %cst_28 : f32 to vector<32x1xf32>
    %81 = arith.cmpf olt, %0, %80 : vector<32x1xf32>
    %82 = arith.andi %79, %81 : vector<32x1xi1>
    %cst_29 = arith.constant 0.000000e+00 : f32
    %83 = vector.shape_cast %82 : vector<32x1xi1> to vector<32x1xi1>
    %84 = vector.broadcast %83 : vector<32x1xi1> to vector<32x32xi1>
    %85 = vector.broadcast %cst_29 : f32 to vector<32x32xf32>
    %86 = arith.select %84, %77, %85 : vector<32x32xi1>, vector<32x32xf32>
    %87 = arith.truncf %86 : vector<32x32xf32> to vector<32x32xbf16>
    %88 = arith.truncf %76 : vector<32x32xf32> to vector<32x32xbf16>
    %c31_i32_30 = arith.constant 31 : i32
    %89 = tpu.dynamic_rotate %76 by %c31_i32_30 dim 0 : vector<32x32xf32>, i32 -> vector<32x32xf32>
    %cst_31 = arith.constant 0.000000e+00 : f32
    %90 = vector.broadcast %cst_31 : f32 to vector<32x1xf32>
    %91 = arith.cmpf oge, %0, %90 : vector<32x1xf32>
    %cst_32 = arith.constant 1.500000e+01 : f32
    %92 = vector.broadcast %cst_32 : f32 to vector<32x1xf32>
    %93 = arith.cmpf olt, %0, %92 : vector<32x1xf32>
    %94 = arith.andi %91, %93 : vector<32x1xi1>
    %cst_33 = arith.constant 0.000000e+00 : f32
    %95 = vector.shape_cast %94 : vector<32x1xi1> to vector<32x1xi1>
    %96 = vector.broadcast %95 : vector<32x1xi1> to vector<32x32xi1>
    %97 = vector.broadcast %cst_33 : f32 to vector<32x32xf32>
    %98 = arith.select %96, %89, %97 : vector<32x32xi1>, vector<32x32xf32>
    %99 = arith.truncf %98 : vector<32x32xf32> to vector<32x32xbf16>
    %100 = tpu.concatenate %87, %88, %99 in 1 : vector<32x32xbf16>, vector<32x32xbf16>, vector<32x32xbf16> -> vector<32x96xbf16>
    %c0_34 = arith.constant 0 : index
    %c0_35 = arith.constant 0 : index
    %101 = vector.load %arg6[%c0_34, %c0_35] : memref<96x32xbf16, #tpu.memory_space<vmem>>, vector<96x32xbf16>
    %cst_36 = arith.constant dense<0.000000e+00> : vector<32x32xf32>
    %102 = tpu.matmul %100, %101, %cst_36 {dimension_numbers = #tpu.dot_dimension_numbers<[1], [0], [0], [1], [0, 0, 1, 1], [], []>} : vector<32x96xbf16>, vector<96x32xbf16>, vector<32x32xf32> -> vector<32x32xf32>
    %c0_37 = arith.constant 0 : index
    %c0_38 = arith.constant 0 : index
    %103 = vector.load %arg7[%c0_37, %c0_38] : memref<1x32xf32, #tpu.memory_space<vmem>>, vector<1x32xf32>
    %104 = vector.broadcast %103 : vector<1x32xf32> to vector<32x32xf32>
    %105 = arith.addf %102, %104 : vector<32x32xf32>
    %cst_39 = arith.constant 0.000000e+00 : f32
    %106 = vector.broadcast %cst_39 : f32 to vector<32x32xf32>
    %107 = arith.maximumf %105, %106 : vector<32x32xf32>
    %c1_i32_40 = arith.constant 1 : i32
    %108 = tpu.dynamic_rotate %107 by %c1_i32_40 dim 0 : vector<32x32xf32>, i32 -> vector<32x32xf32>
    %cst_41 = arith.constant 1.000000e+00 : f32
    %109 = vector.broadcast %cst_41 : f32 to vector<32x1xf32>
    %110 = arith.cmpf oge, %0, %109 : vector<32x1xf32>
    %cst_42 = arith.constant 1.600000e+01 : f32
    %111 = vector.broadcast %cst_42 : f32 to vector<32x1xf32>
    %112 = arith.cmpf olt, %0, %111 : vector<32x1xf32>
    %113 = arith.andi %110, %112 : vector<32x1xi1>
    %cst_43 = arith.constant 0.000000e+00 : f32
    %114 = vector.shape_cast %113 : vector<32x1xi1> to vector<32x1xi1>
    %115 = vector.broadcast %114 : vector<32x1xi1> to vector<32x32xi1>
    %116 = vector.broadcast %cst_43 : f32 to vector<32x32xf32>
    %117 = arith.select %115, %108, %116 : vector<32x32xi1>, vector<32x32xf32>
    %118 = arith.truncf %117 : vector<32x32xf32> to vector<32x32xbf16>
    %119 = arith.truncf %107 : vector<32x32xf32> to vector<32x32xbf16>
    %c31_i32_44 = arith.constant 31 : i32
    %120 = tpu.dynamic_rotate %107 by %c31_i32_44 dim 0 : vector<32x32xf32>, i32 -> vector<32x32xf32>
    %cst_45 = arith.constant 0.000000e+00 : f32
    %121 = vector.broadcast %cst_45 : f32 to vector<32x1xf32>
    %122 = arith.cmpf oge, %0, %121 : vector<32x1xf32>
    %cst_46 = arith.constant 1.500000e+01 : f32
    %123 = vector.broadcast %cst_46 : f32 to vector<32x1xf32>
    %124 = arith.cmpf olt, %0, %123 : vector<32x1xf32>
    %125 = arith.andi %122, %124 : vector<32x1xi1>
    %cst_47 = arith.constant 0.000000e+00 : f32
    %126 = vector.shape_cast %125 : vector<32x1xi1> to vector<32x1xi1>
    %127 = vector.broadcast %126 : vector<32x1xi1> to vector<32x32xi1>
    %128 = vector.broadcast %cst_47 : f32 to vector<32x32xf32>
    %129 = arith.select %127, %120, %128 : vector<32x32xi1>, vector<32x32xf32>
    %130 = arith.truncf %129 : vector<32x32xf32> to vector<32x32xbf16>
    %131 = tpu.concatenate %118, %119, %130 in 1 : vector<32x32xbf16>, vector<32x32xbf16>, vector<32x32xbf16> -> vector<32x96xbf16>
    %c0_48 = arith.constant 0 : index
    %c0_49 = arith.constant 0 : index
    %132 = vector.load %arg8[%c0_48, %c0_49] : memref<96x32xbf16, #tpu.memory_space<vmem>>, vector<96x32xbf16>
    %cst_50 = arith.constant dense<0.000000e+00> : vector<32x32xf32>
    %133 = tpu.matmul %131, %132, %cst_50 {dimension_numbers = #tpu.dot_dimension_numbers<[1], [0], [0], [1], [0, 0, 1, 1], [], []>} : vector<32x96xbf16>, vector<96x32xbf16>, vector<32x32xf32> -> vector<32x32xf32>
    %c0_51 = arith.constant 0 : index
    %c0_52 = arith.constant 0 : index
    %134 = vector.load %arg9[%c0_51, %c0_52] : memref<1x32xf32, #tpu.memory_space<vmem>>, vector<1x32xf32>
    %135 = vector.broadcast %134 : vector<1x32xf32> to vector<32x32xf32>
    %136 = arith.addf %133, %135 : vector<32x32xf32>
    %137 = arith.addf %136, %76 : vector<32x32xf32>
    %cst_53 = arith.constant 0.000000e+00 : f32
    %138 = vector.broadcast %cst_53 : f32 to vector<32x32xf32>
    %139 = arith.maximumf %137, %138 : vector<32x32xf32>
    %140 = arith.truncf %139 : vector<32x32xf32> to vector<32x32xbf16>
    %c0_54 = arith.constant 0 : index
    %c0_55 = arith.constant 0 : index
    %141 = vector.load %arg10[%c0_54, %c0_55] : memref<32x16xbf16, #tpu.memory_space<vmem>>, vector<32x16xbf16>
    %cst_56 = arith.constant dense<0.000000e+00> : vector<32x16xf32>
    %142 = tpu.matmul %140, %141, %cst_56 {dimension_numbers = #tpu.dot_dimension_numbers<[1], [0], [0], [1], [0, 0, 1, 1], [], []>} : vector<32x32xbf16>, vector<32x16xbf16>, vector<32x16xf32> -> vector<32x16xf32>
    %c0_57 = arith.constant 0 : index
    %c0_58 = arith.constant 0 : index
    %143 = vector.load %arg11[%c0_57, %c0_58] : memref<1x16xf32, #tpu.memory_space<vmem>>, vector<1x16xf32>
    %144 = vector.broadcast %143 : vector<1x16xf32> to vector<32x16xf32>
    %145 = arith.addf %142, %144 : vector<32x16xf32>
    %146 = math.tanh %145 : vector<32x16xf32>
    %c0_59 = arith.constant 0 : index
    %c0_60 = arith.constant 0 : index
    %147 = vector.load %arg12[%c0_59, %c0_60] : memref<32x16xbf16, #tpu.memory_space<vmem>>, vector<32x16xbf16>
    %cst_61 = arith.constant dense<0.000000e+00> : vector<32x16xf32>
    %148 = tpu.matmul %140, %147, %cst_61 {dimension_numbers = #tpu.dot_dimension_numbers<[1], [0], [0], [1], [0, 0, 1, 1], [], []>} : vector<32x32xbf16>, vector<32x16xbf16>, vector<32x16xf32> -> vector<32x16xf32>
    %c0_62 = arith.constant 0 : index
    %c0_63 = arith.constant 0 : index
    %149 = vector.load %arg13[%c0_62, %c0_63] : memref<1x16xf32, #tpu.memory_space<vmem>>, vector<1x16xf32>
    %150 = vector.broadcast %149 : vector<1x16xf32> to vector<32x16xf32>
    %151 = arith.addf %148, %150 : vector<32x16xf32>
    %152 = arith.negf %151 : vector<32x16xf32>
    %153 = math.exp %152 : vector<32x16xf32>
    %cst_64 = arith.constant 1.000000e+00 : f32
    %154 = vector.broadcast %cst_64 : f32 to vector<32x16xf32>
    %155 = arith.addf %154, %153 : vector<32x16xf32>
    %156 = arith.divf %154, %155 : vector<32x16xf32>
    %157 = arith.mulf %146, %156 : vector<32x16xf32>
    %158 = vector.shape_cast %157 : vector<32x16xf32> to vector<2x16x16xf32>
    %159 = vector.shape_cast %139 : vector<32x32xf32> to vector<2x16x32xf32>
    %c0_65 = arith.constant 0 : index
    %c0_66 = arith.constant 0 : index
    %160 = vector.load %arg14[%c0_65, %c0_66] : memref<1x16xf32, #tpu.memory_space<vmem>>, vector<1x16xf32>
    %161 = vector.shape_cast %160 : vector<1x16xf32> to vector<1x1x16xf32>
    %162 = vector.broadcast %161 : vector<1x1x16xf32> to vector<2x16x16xf32>
    %163 = arith.mulf %158, %162 : vector<2x16x16xf32>
    %cst_67 = arith.constant dense<0.000000e+00> : vector<2x16xf32>
    %164 = vector.multi_reduction <add>, %163, %cst_67 [2] : vector<2x16x16xf32> to vector<2x16xf32>
    %c0_68 = arith.constant 0 : index
    %c0_69 = arith.constant 0 : index
    %165 = vector.load %arg15[%c0_68, %c0_69] : memref<1x32xf32, #tpu.memory_space<vmem>>, vector<1x32xf32>
    %166 = vector.shape_cast %165 : vector<1x32xf32> to vector<1x1x32xf32>
    %167 = vector.broadcast %166 : vector<1x1x32xf32> to vector<2x16x32xf32>
    %168 = arith.mulf %159, %167 : vector<2x16x32xf32>
    %cst_70 = arith.constant dense<0.000000e+00> : vector<2x16xf32>
    %169 = vector.multi_reduction <add>, %168, %cst_70 [2] : vector<2x16x32xf32> to vector<2x16xf32>
    %c0_71 = arith.constant 0 : index
    %c0_72 = arith.constant 0 : index
    %170 = vector.load %arg3[%c0_71, %c0_72] : memref<2x16xf32, #tpu.memory_space<vmem>>, vector<2x16xf32>
    %cst_73 = arith.constant 0.000000e+00 : f32
    %171 = vector.broadcast %cst_73 : f32 to vector<2x16xf32>
    %172 = arith.cmpf ogt, %170, %171 : vector<2x16xf32>
    %cst_74 = arith.constant -1.000000e+30 : f32
    %173 = vector.broadcast %cst_74 : f32 to vector<2x16xf32>
    %174 = arith.select %172, %164, %173 : vector<2x16xi1>, vector<2x16xf32>
    %cst_75 = arith.constant dense<0xFF800000> : vector<2xf32>
    %175 = vector.multi_reduction <maximumf>, %174, %cst_75 [1] : vector<2x16xf32> to vector<2xf32>
    %176 = vector.shape_cast %175 : vector<2xf32> to vector<2x1xf32>
    %177 = vector.broadcast %176 : vector<2x1xf32> to vector<2x16xf32>
    %178 = arith.subf %174, %177 : vector<2x16xf32>
    %179 = math.exp %178 : vector<2x16xf32>
    %180 = arith.mulf %179, %170 : vector<2x16xf32>
    %cst_76 = arith.constant dense<0.000000e+00> : vector<2xf32>
    %181 = vector.multi_reduction <add>, %180, %cst_76 [1] : vector<2x16xf32> to vector<2xf32>
    %182 = vector.shape_cast %181 : vector<2xf32> to vector<2x1xf32>
    %cst_77 = arith.constant 1.000000e-30 : f32
    %183 = vector.broadcast %cst_77 : f32 to vector<2x1xf32>
    %184 = arith.maximumf %182, %183 : vector<2x1xf32>
    %185 = tpu.reciprocal %184 {approx = true} : vector<2x1xf32> -> vector<2x1xf32>
    %186 = vector.broadcast %185 : vector<2x1xf32> to vector<2x16xf32>
    %187 = arith.mulf %180, %186 : vector<2x16xf32>
    %c0_78 = arith.constant 0 : index
    %c0_79 = arith.constant 0 : index
    %188 = vector.load %arg18[%c0_78, %c0_79] : memref<2x16xf32, #tpu.memory_space<vmem>>, vector<2x16xf32>
    tpu.vector_store %arg18[%c0_78, %c0_79], %187 {strides = array<i32>} : memref<2x16xf32, #tpu.memory_space<vmem>>, vector<2x16xf32>,
    %189 = arith.mulf %187, %169 : vector<2x16xf32>
    %cst_80 = arith.constant dense<0.000000e+00> : vector<2xf32>
    %190 = vector.multi_reduction <add>, %189, %cst_80 [1] : vector<2x16xf32> to vector<2xf32>
    %191 = vector.shape_cast %190 : vector<2xf32> to vector<2x1xf32>
    %c0_81 = arith.constant 0 : index
    %c0_82 = arith.constant 0 : index
    %192 = vector.load %arg16[%c0_81, %c0_82] : memref<1x1xf32, #tpu.memory_space<vmem>>, vector<1x1xf32>
    %193 = vector.broadcast %192 : vector<1x1xf32> to vector<2x1xf32>
    %194 = arith.addf %191, %193 : vector<2x1xf32>
    %c0_83 = arith.constant 0 : index
    %c0_84 = arith.constant 0 : index
    %195 = vector.load %arg17[%c0_83, %c0_84] : memref<2x1xf32, #tpu.memory_space<vmem>>, vector<2x1xf32>
    tpu.vector_store %arg17[%c0_83, %c0_84], %194 {strides = array<i32>} : memref<2x1xf32, #tpu.memory_space<vmem>>, vector<2x1xf32>,
    return
  }
  func.func @transform_0(%arg0: i32) -> (i32, i32) {
    %c0_i32 = arith.constant 0 : i32
    %c0_i32_0 = arith.constant 0 : i32
    return %arg0, %c0_i32 : i32, i32
  }
  func.func @transform_1(%arg0: i32) -> (i32, i32) {
    %c0_i32 = arith.constant 0 : i32
    %c0_i32_0 = arith.constant 0 : i32
    return %arg0, %c0_i32 : i32, i32
  }
  func.func @transform_2(%arg0: i32) -> (i32, i32) {
    %c0_i32 = arith.constant 0 : i32
    %c0_i32_0 = arith.constant 0 : i32
    return %arg0, %c0_i32 : i32, i32
  }
  func.func @transform_3(%arg0: i32) -> (i32, i32) {
    %c0_i32 = arith.constant 0 : i32
    %c0_i32_0 = arith.constant 0 : i32
    %c0_i32_1 = arith.constant 0 : i32
    return %c0_i32, %c0_i32_0 : i32, i32
  }
  func.func @transform_4(%arg0: i32) -> (i32, i32) {
    %c0_i32 = arith.constant 0 : i32
    %c0_i32_0 = arith.constant 0 : i32
    %c0_i32_1 = arith.constant 0 : i32
    return %c0_i32, %c0_i32_0 : i32, i32
  }
  func.func @transform_5(%arg0: i32) -> (i32, i32) {
    %c0_i32 = arith.constant 0 : i32
    %c0_i32_0 = arith.constant 0 : i32
    %c0_i32_1 = arith.constant 0 : i32
    return %c0_i32, %c0_i32_0 : i32, i32
  }
  func.func @transform_6(%arg0: i32) -> (i32, i32) {
    %c0_i32 = arith.constant 0 : i32
    %c0_i32_0 = arith.constant 0 : i32
    %c0_i32_1 = arith.constant 0 : i32
    return %c0_i32, %c0_i32_0 : i32, i32
  }
  func.func @transform_7(%arg0: i32) -> (i32, i32) {
    %c0_i32 = arith.constant 0 : i32
    %c0_i32_0 = arith.constant 0 : i32
    %c0_i32_1 = arith.constant 0 : i32
    return %c0_i32, %c0_i32_0 : i32, i32
  }
  func.func @transform_8(%arg0: i32) -> (i32, i32) {
    %c0_i32 = arith.constant 0 : i32
    %c0_i32_0 = arith.constant 0 : i32
    %c0_i32_1 = arith.constant 0 : i32
    return %c0_i32, %c0_i32_0 : i32, i32
  }
  func.func @transform_9(%arg0: i32) -> (i32, i32) {
    %c0_i32 = arith.constant 0 : i32
    %c0_i32_0 = arith.constant 0 : i32
    %c0_i32_1 = arith.constant 0 : i32
    return %c0_i32, %c0_i32_0 : i32, i32
  }
  func.func @transform_10(%arg0: i32) -> (i32, i32) {
    %c0_i32 = arith.constant 0 : i32
    %c0_i32_0 = arith.constant 0 : i32
    %c0_i32_1 = arith.constant 0 : i32
    return %c0_i32, %c0_i32_0 : i32, i32
  }
  func.func @transform_11(%arg0: i32) -> (i32, i32) {
    %c0_i32 = arith.constant 0 : i32
    %c0_i32_0 = arith.constant 0 : i32
    %c0_i32_1 = arith.constant 0 : i32
    return %c0_i32, %c0_i32_0 : i32, i32
  }
  func.func @transform_12(%arg0: i32) -> (i32, i32) {
    %c0_i32 = arith.constant 0 : i32
    %c0_i32_0 = arith.constant 0 : i32
    %c0_i32_1 = arith.constant 0 : i32
    return %c0_i32, %c0_i32_0 : i32, i32
  }
  func.func @transform_13(%arg0: i32) -> (i32, i32) {
    %c0_i32 = arith.constant 0 : i32
    %c0_i32_0 = arith.constant 0 : i32
    %c0_i32_1 = arith.constant 0 : i32
    return %c0_i32, %c0_i32_0 : i32, i32
  }
  func.func @transform_14(%arg0: i32) -> (i32, i32) {
    %c0_i32 = arith.constant 0 : i32
    %c0_i32_0 = arith.constant 0 : i32
    %c0_i32_1 = arith.constant 0 : i32
    return %c0_i32, %c0_i32_0 : i32, i32
  }
  func.func @transform_15(%arg0: i32) -> (i32, i32) {
    %c0_i32 = arith.constant 0 : i32
    %c0_i32_0 = arith.constant 0 : i32
    %c0_i32_1 = arith.constant 0 : i32
    return %c0_i32, %c0_i32_0 : i32, i32
  }
  func.func @transform_16(%arg0: i32) -> (i32, i32) {
    %c0_i32 = arith.constant 0 : i32
    %c0_i32_0 = arith.constant 0 : i32
    return %arg0, %c0_i32 : i32, i32
  }
  func.func @transform_17(%arg0: i32) -> (i32, i32) {
    %c0_i32 = arith.constant 0 : i32
    %c0_i32_0 = arith.constant 0 : i32
    return %arg0, %c0_i32 : i32, i32
  }
}

</mosaic_0001>

<bundles_post_ra>
// kernel: tile.0
= control target key start
LH: loop header
LB: loop body
LE: loop exit
PB: predicated region body
PF: predicated region fallthrough
CT: control target
= control target key end

     0   :  { %s130_s8 = smov 125   ;;  %s131_s9 = smov 126   ;;  %vm7_vm0 = vcmask 7168   ;;  %s221_s0 = inlined_call_operand.vmem [shape: f32[2,16], index: 0, kind: input, shape index: {}]   ;;  %s222_s1 = inlined_call_operand.vmem [shape: f32[32,1], index: 1, kind: output, shape index: {}]  }
   0x1   :  { %v4_v0 = vld [vmem:[%s221_s0] sm:$0x3]  ;;  %s129_s0 = smov 127   ;;  %s132_s10 = smov 124  }
   0x2   :  { %5 = vst [vmem:[#allocation0] sm:$0x3] %v4_v0  ;;  %s133_s11 = smov 123   ;;  %s134_s12 = smov 122  }
   0x3   :  { %s135_s13 = smov 121   ;;  %s136_s14 = smov 120  }
   0x4   :  { %s137_s17 = smov 119   ;;  %s138_s18 = smov 118  }
   0x5   :  { %s139_s19 = smov 117   ;;  %s140_s20 = smov 116  }
   0x6   :  { %s141_s21 = smov 115   ;;  %s142_s22 = smov 114  }
   0x7   :  { %s143_s23 = smov 113  }
   0x9   :  { %v9_v1 = vld [vmem:[#allocation0] sm:$0x3]  }
   0xa   :  { %v21_v2 = vld [vmem:[#allocation0] sm:$0x3]   ;;  %10 = vrot.lane.b32.xlu0 %v9_v1, %s129_s0 }
   0xb   :  { %22 = vrot.lane.b32.xlu1 %v21_v2, %s130_s8  ;;  %v15_v3 = vld [vmem:[#allocation0] sm:$0x3]  }
   0xc   :  { %v27_v4 = vld [vmem:[#allocation0] sm:$0x3]  }
   0xd   :  { %v33_v5 = vld [vmem:[#allocation0] sm:$0x3]  }
   0xe   :  { %16 = vrot.lane.b32.xlu0 %v15_v3, %s131_s9  ;;  %v39_v6 = vld [vmem:[#allocation0] sm:$0x3]  }
   0xf   :  { %28 = vrot.lane.b32.xlu1 %v27_v4, %s132_s10  ;;  %v45_v7 = vld [vmem:[#allocation0] sm:$0x3]  }
  0x10   :  { %v51_v8 = vld [vmem:[#allocation0] sm:$0x3]  }
  0x11   :  { %v57_v9 = vld [vmem:[#allocation0] sm:$0x3]  }
  0x12   :  { %34 = vrot.lane.b32.xlu0 %v33_v5, %s133_s11  ;;  %v63_v10 = vld [vmem:[#allocation0] sm:$0x3]  }
  0x13   :  { %40 = vrot.lane.b32.xlu1 %v39_v6, %s134_s12  ;;  %v6_v11 = vld [vmem:[#allocation0] sm:$0x3]  }
  0x14   :  { %8 = vst.msk [vmem:[%s222_s1] ss:$16 sm:$0x3] %vm7_vm0, %v6_v11   ;;  %v69_v12 = vld [vmem:[#allocation0] sm:$0x3]  }
  0x15   :  { %v75_v13 = vld [vmem:[#allocation0] sm:$0x3]  }
  0x16   :  { %46 = vrot.lane.b32.xlu0 %v45_v7, %s135_s13  ;;  %v81_v14 = vld [vmem:[#allocation0] sm:$0x3]  }
  0x17   :  { %52 = vrot.lane.b32.xlu1 %v51_v8, %s136_s14  ;;  %v87_v15 = vld [vmem:[#allocation0] sm:$0x3]  }
  0x18   :  { %v93_v16 = vld [vmem:[#allocation0] sm:$0x3]  }
  0x1a   :  { %58 = vrot.lane.b32.xlu0 %v57_v9, %s137_s17 }
  0x1b   :  { %64 = vrot.lane.b32.xlu1 %v63_v10, %s138_s18 }
  0x1e   :  { %70 = vrot.lane.b32.xlu0 %v69_v12, %s139_s19 }
  0x1f   :  { %76 = vrot.lane.b32.xlu1 %v75_v13, %s140_s20 }
  0x22   :  { %82 = vrot.lane.b32.xlu0 %v81_v14, %s141_s21 }
  0x23   :  { %88 = vrot.lane.b32.xlu1 %v87_v15, %s142_s22 }
  0x26   :  { %94 = vrot.lane.b32.xlu0 %v93_v16, %s143_s23 }
  0x7c   :  { %v11_v17 = vpop.permute.xlu0 %10  }
  0x7d   :  { %v23_v18 = vpop.permute.xlu1 %22   ;;  %99 = vst.msk [vmem:[%s222_s1 + $0x1] ss:$16 sm:$0x3] %vm7_vm0, %v11_v17  }
  0x7e   :  { %101 = vst.msk [vmem:[%s222_s1 + $0x3] ss:$16 sm:$0x3] %vm7_vm0, %v23_v18  }
  0x80   :  { %v17_v19 = vpop.permute.xlu0 %16  }
  0x81   :  { %v29_v20 = vpop.permute.xlu1 %28   ;;  %100 = vst.msk [vmem:[%s222_s1 + $0x2] ss:$16 sm:$0x3] %vm7_vm0, %v17_v19  }
  0x82   :  { %102 = vst.msk [vmem:[%s222_s1 + $0x4] ss:$16 sm:$0x3] %vm7_vm0, %v29_v20  }
  0x84   :  { %v35_v21 = vpop.permute.xlu0 %34  }
  0x85   :  { %v41_v22 = vpop.permute.xlu1 %40   ;;  %103 = vst.msk [vmem:[%s222_s1 + $0x5] ss:$16 sm:$0x3] %vm7_vm0, %v35_v21  }
  0x86   :  { %104 = vst.msk [vmem:[%s222_s1 + $0x6] ss:$16 sm:$0x3] %vm7_vm0, %v41_v22  }
  0x88   :  { %v47_v23 = vpop.permute.xlu0 %46  }
  0x89   :  { %v53_v24 = vpop.permute.xlu1 %52   ;;  %105 = vst.msk [vmem:[%s222_s1 + $0x7] ss:$16 sm:$0x3] %vm7_vm0, %v47_v23  }
  0x8a   :  { %106 = vst.msk [vmem:[%s222_s1 + $0x8] ss:$16 sm:$0x3] %vm7_vm0, %v53_v24  }
  0x8c   :  { %v59_v25 = vpop.permute.xlu0 %58  }
  0x8d   :  { %v65_v26 = vpop.permute.xlu1 %64   ;;  %107 = vst.msk [vmem:[%s222_s1 + $0x9] ss:$16 sm:$0x3] %vm7_vm0, %v59_v25  }
  0x8e   :  { %108 = vst.msk [vmem:[%s222_s1 + $0xa] ss:$16 sm:$0x3] %vm7_vm0, %v65_v26  }
  0x90   :  { %v71_v27 = vpop.permute.xlu0 %70  }
  0x91   :  { %v77_v28 = vpop.permute.xlu1 %76   ;;  %109 = vst.msk [vmem:[%s222_s1 + $0xb] ss:$16 sm:$0x3] %vm7_vm0, %v71_v27  }
  0x92   :  { %110 = vst.msk [vmem:[%s222_s1 + $0xc] ss:$16 sm:$0x3] %vm7_vm0, %v77_v28  }
  0x94   :  { %v83_v29 = vpop.permute.xlu0 %82  }
  0x95   :  { %v89_v30 = vpop.permute.xlu1 %88   ;;  %111 = vst.msk [vmem:[%s222_s1 + $0xd] ss:$16 sm:$0x3] %vm7_vm0, %v83_v29  }
  0x96   :  { %112 = vst.msk [vmem:[%s222_s1 + $0xe] ss:$16 sm:$0x3] %vm7_vm0, %v89_v30  }
  0x98   :  { %v95_v31 = vpop.permute.xlu0 %94  }
  0x99   :  { %113 = vst.msk [vmem:[%s222_s1 + $0xf] ss:$16 sm:$0x3] %vm7_vm0, %v95_v31  }

// kernel: cox_attention_resnet.1
= control target key start
LH: loop header
LB: loop body
LE: loop exit
PB: predicated region body
PF: predicated region fallthrough
CT: control target
= control target key end

     0   :  { %s2052_s0 = inlined_call_operand.vmem [shape: f32[32,4], index: 0, kind: input, shape index: {}]   ;;  %s2053_s1 = inlined_call_operand.vmem [shape: f32[32,1], index: 1, kind: input, shape index: {}]   ;;  %s2054_s2 = inlined_call_operand.vmem [shape: f32[2,16], index: 2, kind: input, shape index: {}]   ;;  %s2055_s3 = inlined_call_operand.vmem [shape: bf16[28,32], index: 3, kind: input, shape index: {}]   ;;  %s2056_s4 = inlined_call_operand.vmem [shape: f32[1,32], index: 4, kind: input, shape index: {}]   ;;  %s2057_s5 = inlined_call_operand.vmem [shape: bf16[96,32], index: 5, kind: input, shape index: {}]   ;;  %s2058_s6 = inlined_call_operand.vmem [shape: f32[1,32], index: 6, kind: input, shape index: {}]   ;;  %s2059_s7 = inlined_call_operand.vmem [shape: bf16[96,32], index: 7, kind: input, shape index: {}]   ;;  %s2060_s8 = inlined_call_operand.vmem [shape: f32[1,32], index: 8, kind: input, shape index: {}]   ;;  %s2061_s9 = inlined_call_operand.vmem [shape: bf16[32,16], index: 9, kind: input, shape index: {}]   ;;  %s2062_s10 = inlined_call_operand.vmem [shape: f32[1,16], index: 10, kind: input, shape index: {}]   ;;  %s2063_s11 = inlined_call_operand.vmem [shape: bf16[32,16], index: 11, kind: input, shape index: {}]   ;;  %s2064_s12 = inlined_call_operand.vmem [shape: f32[1,16], index: 12, kind: input, shape index: {}]   ;;  %s2065_s13 = inlined_call_operand.vmem [shape: f32[1,16], index: 13, kind: input, shape index: {}]   ;;  %s2066_s14 = inlined_call_operand.vmem [shape: f32[1,32], index: 14, kind: input, shape index: {}]   ;;  %s2067_s15 = inlined_call_operand.<no memory space> [shape: f32[1,1], index: 15, kind: input, shape index: {}]   ;;  %s2068_s16 = inlined_call_operand.vmem [shape: f32[2,1], index: 16, kind: output, shape index: {0}]   ;;  %s2069_s17 = inlined_call_operand.hbm [shape: f32[2,16], index: 17, kind: output, shape index: {1}]  }
   0x1   :  { %2074 = sst [smem:[#allocation6_spill]] %s2052_s0  ;;  %v23_v0 = vstv %s2067_s15 }
   0x2   :  { %2075 = sst [smem:[#allocation7_spill]] %s2053_s1  ;;  %24 = vst [vmem:[#allocation2] sm:$0x1] %v23_v0 }
   0x3   :  { %s2076_s28 = sld [smem:[#allocation7_spill]]  ;;  %v1364_v4 = vmov 0   ;;  %v71_v10 = vlaneseq  ;;  %s2077_s21 = sld [smem:[#allocation6_spill]] }
   0x4   :  { %1293 = vset.pattern.permute.xlu1 %v1364_v4  ;;  %1292 = vset.pattern.permute.xlu0 %v1364_v4 }
   0x5   :  { %v1546_v17 = vshrl.u32 %v71_v10, 7 }
   0x9   :  { %v1470_v1 = vld [vmem:[%s2076_s28 + $0x10] sm:$0xff]  ;;  %v1475_v2 = vld [vmem:[%s2076_s28] sm:$0xff]  ;;  %v1480_v3 = vld [vmem:[%s2076_s28 + $0x18] sm:$0xff] }
   0xa   :  { %vm2073_vm0 = vcmp.lt.f32.partialorder %v1470_v1, 16.0  ;;  %vm127_vm1 = vcmp.ge.f32.partialorder %v1470_v1, 2.0  ;;  %vm82_vm2 = vcmp.lt.f32.partialorder %v1475_v2, 16.0  ;;  %vm125_vm3 = vcmp.ge.f32.partialorder %v1475_v2, 2.0  ;;  %v1491_v5 = vld [vmem:[%s2076_s28 + $0x8] sm:$0xff]  ;;  %v1525_v12 = vld [vmem:[%s2077_s21 + $0x10] sm:$0xff] }
   0xb   :  { %vm131_vm4 = vmand %vm127_vm1, %vm2073_vm0  ;;  %vm85_vm5 = vcmp.lt.f32.partialorder %v1480_v3, 16.0  ;;  %vm128_vm6 = vcmp.ge.f32.partialorder %v1480_v3, 2.0  ;;  %vm83_vm7 = vcmp.lt.f32.partialorder %v1491_v5, 16.0  ;;  %vm126_vm8 = vcmp.ge.f32.partialorder %v1491_v5, 2.0  ;;  %v1520_v11 = vld [vmem:[%s2077_s21 + $0x8] sm:$0xff]  ;;  %v1531_v14 = vld [vmem:[%s2077_s21] sm:$0xff] }
   0xc   :  { %v135_v6 = vsel %vm131_vm4, 1, %v1364_v4  ;;  %vm129_vm9 = vmand %vm125_vm3, %vm82_vm2  ;;  %vm169_vm10 = vcmp.ge.f32.partialorder %v1491_v5, 1.0  ;;  %vm168_vm12 = vcmp.ge.f32.partialorder %v1475_v2, 1.0  ;;  %vm171_vm1 = vcmp.ge.f32.partialorder %v1480_v3, 1.0  ;;  %v1536_v15 = vld [vmem:[%s2077_s21 + $0x18] sm:$0xff] }
   0xd   :  { %144 = vperm.xlu1 %1293, %v135_v6   ;;  %v133_v7 = vsel %vm129_vm9, 1, %v1364_v4  ;;  %vm132_vm11 = vmand %vm128_vm6, %vm85_vm5  ;;  %vm170_vm3 = vcmp.ge.f32.partialorder %v1470_v1, 1.0  ;;  %vm214_vm6 = vcmp.ge.f32.partialorder %v1491_v5, 0.0  ;;  %vm218_vm9 = vcmp.lt.f32.partialorder %v1491_v5, 15.0 }
   0xe   :  { %138 = vperm.xlu0 %1292, %v133_v7   ;;  %v136_v8 = vsel %vm132_vm11, 1, %v1364_v4  ;;  %vm130_vm13 = vmand %vm126_vm8, %vm83_vm7  ;;  %v117_v18 = vrot.slane %v1520_v11, 6  ;;  %v118_v19 = vrot.slane %v1525_v12, 6  ;;  %vm217_vm11 = vcmp.lt.f32.partialorder %v1475_v2, 15.0 }
   0xf   :  { %v134_v9 = vsel %vm130_vm13, 1, %v1364_v4  ;;  %vm173_vm14 = vmand %vm169_vm10, %vm83_vm7  ;;  %vm213_vm10 = vcmp.ge.f32.partialorder %v1475_v2, 0.0  ;;  %v116_v20 = vrot.slane %v1531_v14, 6  ;;  %v119_v21 = vrot.slane %v1536_v15, 6 }
  0x10   :  { %vm172_vm15 = vmand %vm168_vm12, %vm82_vm2  ;;  %v177_v13 = vsel %vm173_vm14, 1, %v1364_v4  ;;  %vm216_vm12 = vcmp.ge.f32.partialorder %v1480_v3, 0.0  ;;  %vm120_vm13 = vcmp.lt.s32.totalorder %v1546_v17, 2  ;;  %v159_v23 = vrot.slane %v1531_v14, 7 }
  0x11   :  { %147 = vperm.xlu1 %1293, %v136_v8   ;;  %v176_v16 = vsel %vm172_vm15, 1, %v1364_v4  ;;  %vm175_vm4 = vmand %vm171_vm1, %vm85_vm5  ;;  %v1563_v25 = vsel %vm120_vm13, %v117_v18, %v118_v19  ;;  %v1565_v26 = vsel %vm120_vm13, %v119_v21, %v116_v20  ;;  %v1567_v27 = vsel %vm120_vm13, %v118_v19, %v119_v21 }
  0x12   :  { %141 = vperm.xlu0 %1292, %v134_v9   ;;  %vm174_vm8 = vmand %vm170_vm3, %vm2073_vm0  ;;  %v179_v22 = vsel %vm175_vm4, 1, %v1364_v4  ;;  %vm220_vm1 = vcmp.lt.f32.partialorder %v1480_v3, 15.0  ;;  %v1572_v28 = vsel %vm120_vm13, %v116_v20, %v117_v18  ;;  %v160_v29 = vrot.slane %v1520_v11, 7 }
  0x13   :  { %v178_v24 = vsel %vm174_vm8, 1, %v1364_v4  ;;  %vm222_vm14 = vmand %vm214_vm6, %vm218_vm9  ;;  %vm2072_vm3 = vcmp.lt.s32.totalorder %v1546_v17, 1  ;;  %vm215_vm4 = vcmp.ge.f32.partialorder %v1470_v1, 0.0  ;;  %vm219_vm8 = vcmp.lt.f32.partialorder %v1470_v1, 15.0 }
  0x14   :  { %vm221_vm15 = vmand %vm213_vm10, %vm217_vm11  ;;  %v162_v30 = vrot.slane %v1536_v15, 7  ;;  %v161_v31 = vrot.slane %v1525_v12, 7  ;;  %v226_v32 = vsel %vm222_vm14, 1, %v1364_v4  ;;  %v1583_v33 = vsel %vm2072_vm3, %v159_v23, %v160_v29 }
  0x15   :  { %184 = vperm.xlu1 %1293, %v177_v13   ;;  %v225_v34 = vsel %vm221_vm15, 1, %v1364_v4  ;;  %vm224_vm9 = vmand %vm216_vm12, %vm220_vm1  ;;  %vm261_vm13 = vcmp.lt.f32.partialorder %v1491_v5, 14.0  ;;  %v205_v38 = vrot.slane %v1520_v11, 1  ;;  %v206_v39 = vrot.slane %v1525_v12, 1 }
  0x16   :  { %181 = vperm.xlu0 %1292, %v176_v16   ;;  %v1590_v35 = vsel %vm2072_vm3, %v162_v30, %v159_v23  ;;  %v1594_v36 = vsel %vm2072_vm3, %v161_v31, %v162_v30  ;;  %v1598_v37 = vsel %vm2072_vm3, %v160_v29, %v161_v31  ;;  %vm223_vm11 = vmand %vm215_vm4, %vm219_vm8  ;;  %vm208_vm14 = vcmp.lt.s32.totalorder %v1546_v17, 7 }
  0x17   :  { %vm260_vm15 = vcmp.lt.f32.partialorder %v1475_v2, 14.0  ;;  %v204_v40 = vrot.slane %v1531_v14, 1  ;;  %v228_v41 = vsel %vm224_vm9, 1, %v1364_v4  ;;  %v1611_v42 = vsel %vm208_vm14, %v205_v38, %v206_v39  ;;  %vm265_vm1 = vmand %vm214_vm6, %vm261_vm13 }
  0x18   :  { %v227_v43 = vsel %vm223_vm11, 1, %v1364_v4  ;;  %vm264_vm8 = vmand %vm213_vm10, %vm260_vm15  ;;  %vm263_vm3 = vcmp.lt.f32.partialorder %v1480_v3, 14.0  ;;  %v207_v45 = vrot.slane %v1536_v15, 1  ;;  %vm262_vm9 = vcmp.lt.f32.partialorder %v1470_v1, 14.0 }
  0x19   :  { %190 = vperm.xlu1 %1293, %v179_v22   ;;  %v1618_v44 = vsel %vm208_vm14, %v204_v40, %v205_v38  ;;  %v269_v46 = vsel %vm265_vm1, 1, %v1364_v4  ;;  %vm304_vm11 = vcmp.lt.f32.partialorder %v1491_v5, 13.0  ;;  %v268_v49 = vsel %vm264_vm8, 1, %v1364_v4  ;;  %vm267_vm13 = vmand %vm216_vm12, %vm263_vm3 }
  0x1a   :  { %187 = vperm.xlu0 %1292, %v178_v24   ;;  %v1629_v47 = vsel %vm208_vm14, %v207_v45, %v204_v40  ;;  %v1633_v48 = vsel %vm208_vm14, %v206_v39, %v207_v45  ;;  %vm303_vm15 = vcmp.lt.f32.partialorder %v1475_v2, 13.0  ;;  %vm266_vm1 = vmand %vm215_vm4, %vm262_vm9  ;;  %v252_v50 = vrot.slane %v1520_v11, 2 }
  0x1b   :  { %v253_v51 = vrot.slane %v1525_v12, 2  ;;  %vm255_vm0 = vcmp.lt.s32.totalorder %v1546_v17, 6  ;;  %v251_v52 = vrot.slane %v1531_v14, 2  ;;  %v271_v53 = vsel %vm267_vm13, 1, %v1364_v4 }
  0x1d   :  { %233 = vperm.xlu1 %1293, %v226_v32   ;;  %v1648_v54 = vsel %vm255_vm0, %v252_v50, %v253_v51  ;;  %v1652_v55 = vsel %vm255_vm0, %v251_v52, %v252_v50 }
  0x1e   :  { %230 = vperm.xlu0 %1292, %v225_v34  }
  0x21   :  { %239 = vperm.xlu1 %1293, %v228_v41  }
  0x22   :  { %236 = vperm.xlu0 %1292, %v227_v43  }
  0x25   :  { %276 = vperm.xlu1 %1293, %v269_v46  }
  0x26   :  { %273 = vperm.xlu0 %1292, %v268_v49  }
  0x27   :  { %25 = vsyncpa [#allocation4], 0  ;;  %v270_v56 = vsel %vm266_vm1, 1, %v1364_v4  ;;  %vm306_vm9 = vcmp.lt.f32.partialorder %v1480_v3, 13.0  ;;  %v254_v57 = vrot.slane %v1536_v15, 2  ;;  %vm305_vm13 = vcmp.lt.f32.partialorder %v1470_v1, 13.0 }
  0x28   :  { %vm308_vm3 = vmand %vm214_vm6, %vm304_vm11  ;;  %v295_v62 = vrot.slane %v1520_v11, 3  ;;  %v296_v63 = vrot.slane %v1525_v12, 3  ;;  %v294_v0 = vrot.slane %v1531_v14, 3  ;;  %vm81_vm1 = vcmp.ge.f32.partialorder %v1480_v3, 3.0  ;;  %s1365_s28 = smov 12   ;;  %s1366_s29 = smov 4  }
  0x29   :  { %vm307_vm8 = vmand %vm213_vm10, %vm303_vm15  ;;  %282 = vperm.xlu1 %1293, %v271_v53   ;;  %v312_v58 = vsel %vm308_vm3, 1, %v1364_v4  ;;  %v1667_v59 = vsel %vm255_vm0, %v254_v57, %v251_v52  ;;  %v1671_v60 = vsel %vm255_vm0, %v253_v51, %v254_v57  ;;  %vm79_vm10 = vcmp.ge.f32.partialorder %v1491_v5, 3.0  ;;  %s1367_s0 = smov 8   ;;  %s1368_s15 = smov 16  }
  0x2a   :  { %279 = vperm.xlu0 %1292, %v270_v56   ;;  %v311_v61 = vsel %vm307_vm8, 1, %v1364_v4  ;;  %vm310_vm6 = vmand %vm216_vm12, %vm306_vm9  ;;  %vm298_vm15 = vcmp.lt.s32.totalorder %v1546_v17, 5  ;;  %vm78_vm0 = vcmp.ge.f32.partialorder %v1475_v2, 3.0  ;;  %v297_v13 = vrot.slane %v1536_v15, 3  ;;  %v1294_v56 = vld [vmem:[%s2055_s3] sm:$0xff]   ;;  %s1370_s20 = smov 24  }
  0x2b   :  { %vm309_vm11 = vmand %vm215_vm4, %vm305_vm13  ;;  %v314_v6 = vsel %vm310_vm6, 1, %v1364_v4  ;;  %v1687_v7 = vsel %vm298_vm15, %v295_v62, %v296_v63  ;;  %v1691_v8 = vsel %vm298_vm15, %v294_v0, %v295_v62  ;;  %vm80_vm3 = vcmp.ge.f32.partialorder %v1470_v1, 3.0  ;;  %1225 = vmatprep.subr.bf16.mxu0 %v1294_v56  ;;  %v1295_v62 = vld [vmem:[%s2055_s3 + $0x8] sm:$0x3f]   ;;  %s1369_s3 = smov 20  }
  0x2c   :  { %v313_v9 = vsel %vm309_vm11, 1, %v1364_v4  ;;  %vm87_vm12 = vmand %vm79_vm10, %vm83_vm7  ;;  %v1704_v18 = vsel %vm298_vm15, %v297_v13, %v294_v0  ;;  %v1708_v5 = vsel %vm298_vm15, %v296_v63, %v297_v13  ;;  %vm2078_vm7 = vcmp.lt.f32.partialorder %v1470_v1, 16.0  ;;  %1226 = vmatpush3.bf16.msra.mxu0 %v1294_v56 }
  0x2d   :  { %319 = vperm.xlu1 %1293, %v312_v58   ;;  %vm86_vm4 = vmand %vm78_vm0, %vm82_vm2  ;;  %v91_v16 = vsel %vm87_vm12, 1, %v1364_v4  ;;  %v67_v19 = vrot.slane %v1531_v14, 5  ;;  %v68_v20 = vrot.slane %v1520_v11, 5  ;;  %vm73_vm9 = vcmp.lt.s32.totalorder %v1546_v17, 3 }
  0x2e   :  { %316 = vperm.xlu0 %1292, %v311_v61   ;;  %v90_v2 = vsel %vm86_vm4, 1, %v1364_v4  ;;  %vm89_vm2 = vmand %vm81_vm1, %vm85_vm5  ;;  %v70_v21 = vrot.slane %v1536_v15, 5  ;;  %v69_v1 = vrot.slane %v1525_v12, 5  ;;  %v203_v29 = vpack.c.bf16 %v1536_v15, %v1525_v12 }
  0x2f   :  { %vm88_vm8 = vmand %vm80_vm3, %vm2078_vm7  ;;  %v93_v22 = vsel %vm89_vm2, 1, %v1364_v4  ;;  %v1720_v23 = vsel %vm73_vm9, %v67_v19, %v68_v20  ;;  %v202_v30 = vpack.c.bf16 %v1520_v11, %v1531_v14  ;;  %vm432_vm7 = vcmask 1045504  }
  0x30   :  { %v1722_v24 = vsel %vm73_vm9, %v70_v21, %v67_v19  ;;  %v92_v3 = vsel %vm88_vm8, 1, %v1364_v4  ;;  %v1730_v31 = vsel %vm73_vm9, %v69_v1, %v70_v21  ;;  %v1732_v32 = vsel %vm73_vm9, %v68_v20, %v69_v1  ;;  %1281 = vmatprep.subr.msk.bf16.mxu0 %vm432_vm7, %v1295_v62 }
  0x31   :  { %325 = vperm.xlu1 %1293, %v314_v6   ;;  %v434_v0 = vsel %vm432_vm7, %v1295_v62, 0 }
  0x32   :  { %322 = vperm.xlu0 %1292, %v313_v9   ;;  %1228 = vmatpush3.bf16.msra.mxu0 %v434_v0  ;;  %v1298_v0 = vld [vmem:[%s2057_s5 + $0x10] sm:$0xff]  }
  0x35   :  { %98 = vperm.xlu1 %1293, %v91_v16  }
  0x36   :  { %95 = vperm.xlu0 %1292, %v90_v2  }
  0x39   :  { %104 = vperm.xlu1 %1293, %v93_v22  }
  0x3a   :  { %101 = vperm.xlu0 %1292, %v92_v3  }
  0x3d   :  { %353 = vrot.lane.b32.xlu1 %v203_v29, %s1365_s28 }
  0x3e   :  { %351 = vrot.lane.b32.xlu0 %v202_v30, %s1365_s28 }
  0x8c   :  { %v145_v34 = vpop.permute.xlu1 %144 }
  0x8d   :  { %v139_v38 = vpop.permute.xlu0 %138  ;;  %vm151_vm5 = vcmp.eq.s32.totalorder %v145_v34, 1 }
  0x8e   :  { %vm149_vm13 = vcmp.eq.s32.totalorder %v139_v38, 1  ;;  %v155_v12 = vsel %vm151_vm5, %v1563_v25, 0.0 }
  0x8f   :  { %v153_v11 = vsel %vm149_vm13, %v1565_v26, 0.0 }
  0x90   :  { %v148_v4 = vpop.permute.xlu1 %147 }
  0x91   :  { %vm152_vm6 = vcmp.eq.s32.totalorder %v148_v4, 1  ;;  %v142_v39 = vpop.permute.xlu0 %141 }
  0x92   :  { %v156_v15 = vsel %vm152_vm6, %v1567_v27, 0.0  ;;  %vm150_vm10 = vcmp.eq.s32.totalorder %v142_v39, 1 }
  0x93   :  { %v158_v14 = vpack.c.bf16 %v156_v15, %v155_v12  ;;  %v154_v40 = vsel %vm150_vm10, %v1572_v28, 0.0 }
  0x94   :  { %v157_v41 = vpack.c.bf16 %v154_v40, %v153_v11  ;;  %v1738_v43 = vpop.permute.xlu1 %184 }
  0x95   :  { %vm193_vm11 = vcmp.eq.s32.totalorder %v1738_v43, 1  ;;  %v1741_v45 = vpop.permute.xlu0 %181  ;;  %341 = vrot.lane.b32.xlu1 %v158_v14, %s1366_s29  ;;  %v1308_v43 = vld [vmem:[%s2063_s11] sm:$0xff]  }
  0x96   :  { %v197_v25 = vsel %vm193_vm11, %v1583_v33, 0.0  ;;  %vm192_vm15 = vcmp.eq.s32.totalorder %v1741_v45, 1  ;;  %339 = vrot.lane.b32.xlu0 %v157_v41, %s1366_s29  ;;  %v1309_v45 = vld [vmem:[%s2061_s9] sm:$0xff]  }
  0x97   :  { %v196_v26 = vsel %vm192_vm15, %v1590_v35, 0.0 }
  0x98   :  { %v200_v27 = vpack.c.bf16 %v197_v25, %v196_v26  ;;  %v1750_v28 = vpop.permute.xlu1 %190 }
  0x99   :  { %vm195_vm0 = vcmp.eq.s32.totalorder %v1750_v28, 1  ;;  %v1753_v46 = vpop.permute.xlu0 %187 }
  0x9a   :  { %v199_v49 = vsel %vm195_vm0, %v1594_v36, 0.0  ;;  %vm194_vm12 = vcmp.eq.s32.totalorder %v1753_v46, 1  ;;  %345 = vrot.lane.b32.xlu0 %v200_v27, %s1367_s0 }
  0x9b   :  { %v198_v33 = vsel %vm194_vm12, %v1598_v37, 0.0 }
  0x9c   :  { %v201_v35 = vpack.c.bf16 %v199_v49, %v198_v33  ;;  %v1762_v50 = vpop.permute.xlu1 %233 }
  0x9d   :  { %vm242_vm4 = vcmp.eq.s32.totalorder %v1762_v50, 1  ;;  %v1765_v51 = vpop.permute.xlu0 %230 }
  0x9e   :  { %v246_v52 = vsel %vm242_vm4, %v1611_v42, 0.0  ;;  %vm241_vm1 = vcmp.eq.s32.totalorder %v1765_v51, 1  ;;  %347 = vrot.lane.b32.xlu1 %v201_v35, %s1367_s0 }
  0x9f   :  { %v245_v36 = vsel %vm241_vm1, %v1618_v44, 0.0 }
  0xa0   :  { %v249_v53 = vpack.c.bf16 %v246_v52, %v245_v36  ;;  %v1774_v37 = vpop.permute.xlu1 %239 }
  0xa1   :  { %vm244_vm3 = vcmp.eq.s32.totalorder %v1774_v37, 1  ;;  %v1780_v57 = vpop.permute.xlu0 %236 }
  0xa2   :  { %v248_v42 = vsel %vm244_vm3, %v1629_v47, 0.0  ;;  %vm243_vm2 = vcmp.eq.s32.totalorder %v1780_v57, 1  ;;  %357 = vrot.lane.b32.xlu0 %v249_v53, %s1368_s15 }
  0xa3   :  { %v247_v44 = vsel %vm243_vm2, %v1633_v48, 0.0 }
  0xa4   :  { %v250_v58 = vpack.c.bf16 %v248_v42, %v247_v44  ;;  %v277_v61 = vpop.permute.xlu1 %276 }
  0xa5   :  { %vm285_vm8 = vcmp.eq.s32.totalorder %v277_v61, 1  ;;  %v274_v63 = vpop.permute.xlu0 %273 }
  0xa6   :  { %v289_v47 = vsel %vm285_vm8, %v1648_v54, 0.0  ;;  %vm284_vm9 = vcmp.eq.s32.totalorder %v274_v63, 1  ;;  %359 = vrot.lane.b32.xlu1 %v250_v58, %s1368_s15  ;;  %v1296_v63 = vld [vmem:[%s2057_s5] sm:$0xff]  }
  0xa7   :  { %v288_v6 = vsel %vm284_vm9, %v1652_v55, 0.0  ;;  %1233 = vmatprep.subr.bf16.mxu1 %v1296_v63 }
  0xa8   :  { %v292_v48 = vpack.c.bf16 %v289_v47, %v288_v6  ;;  %v283_v9 = vpop.permute.xlu1 %282  ;;  %v1297_v47 = vld [vmem:[%s2057_s5 + $0x8] sm:$0xff]   ;;  %1234 = vmatpush3.bf16.msra.mxu1 %v1296_v63  ;;  %v1299_v6 = vld [vmem:[%s2057_s5 + $0x18] sm:$0xff]  }
  0xa9   :  { %vm287_vm5 = vcmp.eq.s32.totalorder %v283_v9, 1  ;;  %v280_v13 = vpop.permute.xlu0 %279  ;;  %1235 = vmatprep.subr.bf16.mxu1 %v1297_v47  ;;  %v1301_v9 = vld [vmem:[%s2057_s5 + $0x28] sm:$0xff]  }
  0xaa   :  { %v291_v16 = vsel %vm287_vm5, %v1667_v59, 0.0  ;;  %vm286_vm13 = vcmp.eq.s32.totalorder %v280_v13, 1  ;;  %363 = vrot.lane.b32.xlu0 %v292_v48, %s1369_s3  ;;  %v1300_v48 = vld [vmem:[%s2057_s5 + $0x20] sm:$0xff]   ;;  %s1372_s5 = smov 64  }
  0xab   :  { %v290_v2 = vsel %vm286_vm13, %v1671_v60, 0.0  ;;  %v1157_v13 = vld [vmem:[%s2056_s4] ss:$0 sm:$0xff]  ;;  %s1371_s4 = smov 32  }
  0xac   :  { %v293_v19 = vpack.c.bf16 %v291_v16, %v290_v2  ;;  %v320_v54 = vpop.permute.xlu1 %319  ;;  %1236 = vmatpush3.bf16.msra.mxu1 %v1297_v47 }
  0xad   :  { %vm328_vm6 = vcmp.eq.s32.totalorder %v320_v54, 1  ;;  %v317_v20 = vpop.permute.xlu0 %316  ;;  %1237 = vmatprep.subr.bf16.mxu1 %v1298_v0 }
  0xae   :  { %v332_v21 = vsel %vm328_vm6, %v1687_v7, 0.0  ;;  %vm327_vm10 = vcmp.eq.s32.totalorder %v317_v20, 1  ;;  %365 = vrot.lane.b32.xlu1 %v293_v19, %s1369_s3 }
  0xaf   :  { %v331_v55 = vsel %vm327_vm10, %v1691_v8, 0.0  ;;  %vm373_vm10 = vcmask 31744  }
  0xb0   :  { %v335_v22 = vpack.c.bf16 %v332_v21, %v331_v55  ;;  %v326_v3 = vpop.permute.xlu1 %325  ;;  %1238 = vmatpush3.bf16.msra.mxu1 %v1298_v0 }
  0xb1   :  { %vm330_vm7 = vcmp.eq.s32.totalorder %v326_v3, 1  ;;  %v323_v1 = vpop.permute.xlu0 %322  ;;  %1239 = vmatprep.subr.bf16.mxu1 %v1299_v6 }
  0xb2   :  { %v334_v59 = vsel %vm330_vm7, %v1704_v18, 0.0  ;;  %vm329_vm8 = vcmp.eq.s32.totalorder %v323_v1, 1  ;;  %369 = vrot.lane.b32.xlu0 %v335_v22, %s1370_s20  ;;  %vm380_vm7 = vcmask 64512  }
  0xb3   :  { %v333_v60 = vsel %vm329_vm8, %v1708_v5, 0.0  ;;  %vm385_vm8 = vcmask 97280  }
  0xb4   :  { %v336_v29 = vpack.c.bf16 %v334_v59, %v333_v60  ;;  %v99_v30 = vpop.permute.xlu1 %98  ;;  %1240 = vmatpush3.bf16.msra.mxu1 %v1299_v6  ;;  %v1302_v6 = vld [vmem:[%s2059_s7] sm:$0xff]  }
  0xb5   :  { %vm107_vm9 = vcmp.eq.s32.totalorder %v99_v30, 1  ;;  %v96_v34 = vpop.permute.xlu0 %95  ;;  %1241 = vmatprep.subr.bf16.mxu1 %v1300_v48  ;;  %1249 = vmatprep.subr.bf16.mxu0 %v1302_v6 }
  0xb6   :  { %v111_v7 = vsel %vm107_vm9, %v1720_v23, 0.0  ;;  %vm106_vm5 = vcmp.eq.s32.totalorder %v96_v34, 1  ;;  %371 = vrot.lane.b32.xlu1 %v336_v29, %s1370_s20  ;;  %vm390_vm9 = vcmask 130048  }
  0xb7   :  { %v110_v8 = vsel %vm106_vm5, %v1722_v24, 0.0  ;;  %vm395_vm5 = vcmask 162816  }
  0xb8   :  { %v114_v38 = vpack.c.bf16 %v111_v7, %v110_v8  ;;  %v105_v4 = vpop.permute.xlu1 %104  ;;  %1242 = vmatpush3.bf16.msra.mxu1 %v1300_v48  ;;  %v1303_v48 = vld [vmem:[%s2059_s7 + $0x8] sm:$0xff]  }
  0xb9   :  { %vm109_vm13 = vcmp.eq.s32.totalorder %v105_v4, 1  ;;  %v102_v39 = vpop.permute.xlu0 %101  ;;  %1243 = vmatprep.subr.bf16.mxu1 %v1301_v9 }
  0xba   :  { %v113_v18 = vsel %vm109_vm13, %v1730_v31, 0.0  ;;  %vm108_vm6 = vcmp.eq.s32.totalorder %v102_v39, 1  ;;  %vm400_vm13 = vcmask 195584  }
  0xbb   :  { %v112_v12 = vsel %vm108_vm6, %v1732_v32, 0.0  ;;  %vm427_vm6 = vcmask 228352  }
  0xbc   :  { %v115_v5 = vpack.c.bf16 %v113_v18, %v112_v12  ;;  %v354_v11 = vpop.permute.xlu1 %353  ;;  %1244 = vmatpush3.bf16.msra.mxu1 %v1301_v9  ;;  %v1304_v9 = vld [vmem:[%s2059_s7 + $0x10] sm:$0xff]  }
  0xbd   :  { %v352_v15 = vpop.permute.xlu0 %351  ;;  %1265 = vmatprep.subr.bf16.mxu1 %v1309_v45 }
 0x107   :  { %v342_v40 = vpop.permute.xlu1 %341 }
 0x108   :  { %v340_v14 = vpop.permute.xlu0 %339  ;;  %v379_v31 = vsel %vm373_vm10, %v115_v5, %v342_v40 }
 0x109   :  { %v376_v24 = vsel %vm373_vm10, %v114_v38, %v340_v14  ;;  %vm2079_vm10 = vcmp.lt.s32.totalorder %v1546_v17, 1 }
 0x10c   :  { %v346_v41 = vpop.permute.xlu0 %345 }
 0x10d   :  { %v382_v26 = vsel %vm380_vm7, %v376_v24, %v346_v41 }
 0x10e   :  { %v387_v33 = vsel %vm385_vm8, %v382_v26, %v352_v15 }
 0x110   :  { %v348_v23 = vpop.permute.xlu1 %347 }
 0x111   :  { %v384_v32 = vsel %vm380_vm7, %v379_v31, %v348_v23  ;;  %vm2080_vm7 = vmmov %vm2079_vm10 }
 0x112   :  { %v389_v42 = vsel %vm385_vm8, %v384_v32, %v354_v11  ;;  %vm2081_vm8 = vmmov %vm2080_vm7 }
 0x114   :  { %v358_v25 = vpop.permute.xlu0 %357 }
 0x115   :  { %v392_v35 = vsel %vm390_vm9, %v387_v33, %v358_v25 }
 0x118   :  { %v360_v27 = vpop.permute.xlu1 %359 }
 0x119   :  { %v394_v44 = vsel %vm390_vm9, %v389_v42, %v360_v27 }
 0x11c   :  { %v364_v49 = vpop.permute.xlu0 %363 }
 0x11d   :  { %v397_v52 = vsel %vm395_vm5, %v392_v35, %v364_v49 }
 0x120   :  { %v366_v36 = vpop.permute.xlu1 %365 }
 0x121   :  { %v399_v58 = vsel %vm395_vm5, %v394_v44, %v366_v36  ;;  %vm2082_vm5 = vmmov %vm2080_vm7 }
 0x124   :  { %v370_v53 = vpop.permute.xlu0 %369 }
 0x125   :  { %v402_v56 = vsel %vm400_vm13, %v397_v52, %v370_v53 }
 0x126   :  { %1229 = vmatprep.mubr.msk.bf16.mxu0 %vm427_vm6, %v402_v56 }
 0x128   :  { %v372_v61 = vpop.permute.xlu1 %371 }
 0x129   :  { %v404_v62 = vsel %vm400_vm13, %v399_v58, %v372_v61  ;;  %vm531_vm13 = vcmask 261120  }
 0x12a   :  { %1230 = vmatmul.mubr.msk.bf16.vlgmr.msra.gmra.mrb[0].mxu0 %vm427_vm6, %v404_v62  ;;  %vm538_vm6 = vcmask 523264  }
 0x12b   :  { %1250 = vmatpush3.bf16.msra.mxu0 %v1302_v6 }
 0x12c   :  { %1251 = vmatprep.subr.bf16.mxu0 %v1303_v48 }
 0x12f   :  { %1252 = vmatpush3.bf16.msra.mxu0 %v1303_v48  ;;  %v1310_v48 = vld [vmem:[%s2063_s11 + $0x8] sm:$0xff]  }
 0x130   :  { %1253 = vmatprep.subr.bf16.mxu0 %v1304_v9 }
 0x133   :  { %1254 = vmatpush3.bf16.msra.mxu0 %v1304_v9  ;;  %v1311_v9 = vld [vmem:[%s2061_s9 + $0x8] sm:$0xff]  }
 0x1fd   :  { %v1231_v16 = vpop.f32.mrb[0].mxu0 }
 0x1fe   :  { %v479_v2 = vadd.f32 %v1231_v16, %v1157_v13  ;;  %v470_v19 = vpop.f32.mrb[1].mxu0  ;;  %v1306_v16 = vld [vmem:[%s2059_s7 + $0x20] sm:$0xff]  }
 0x1ff   :  { %v471_v54 = vadd.f32 %v1157_v13, %v470_v19  ;;  %v1232_v20 = vpop.f32.mrb[2].mxu0  ;;  %v1162_v19 = vld [vmem:[%s2058_s6] ss:$0 sm:$0xff] }
 0x200   :  { %v1827_v21 = vmax.f32 %v479_v2, 0.0  ;;  %v482_v55 = vadd.f32 %v1232_v20, %v1157_v13  ;;  %v473_v22 = vpop.f32.mrb[3].mxu0  ;;  %v1307_v2 = vld [vmem:[%s2059_s7 + $0x28] sm:$0xff]  }
 0x201   :  { %v1829_v3 = vmax.f32 %v471_v54, 0.0  ;;  %v474_v1 = vadd.f32 %v1157_v13, %v473_v22  ;;  %v1305_v13 = vld [vmem:[%s2059_s7 + $0x18] sm:$0xff]  }
 0x202   :  { %v1831_v59 = vmax.f32 %v482_v55, 0.0  ;;  %v507_v30 = vrot.slane %v1827_v21, 1  ;;  %v491_v26 = vrot.slane %v1827_v21, 7  ;;  %1255 = vmatprep.subr.bf16.mxu0 %v1305_v13 }
 0x203   :  { %v505_v60 = vrot.slane %v1829_v3, 1  ;;  %v1834_v29 = vmax.f32 %v474_v1, 0.0  ;;  %v489_v23 = vrot.slane %v1829_v3, 7  ;;  %1256 = vmatpush3.bf16.msra.mxu0 %v1305_v13  ;;  %v1171_v13 = vld [vmem:[%s2060_s8] ss:$0 sm:$0xff] }
 0x204   :  { %v508_v34 = vrot.slane %v1831_v59, 1  ;;  %v504_v7 = vpack.c.bf16 %v1831_v59, %v1827_v21  ;;  %v492_v25 = vrot.slane %v1831_v59, 7  ;;  %1257 = vmatprep.subr.bf16.mxu0 %v1306_v16 }
 0x205   :  { %v506_v8 = vrot.slane %v1834_v29, 1  ;;  %v503_v38 = vpack.c.bf16 %v1834_v29, %v1829_v3  ;;  %v490_v24 = vrot.slane %v1834_v29, 7 }
 0x206   :  { %523 = vrot.lane.b32.xlu1 %v504_v7, %s1371_s4  ;;  %v509_v4 = vsel %vm208_vm14, %v507_v30, %v508_v34  ;;  %v512_v39 = vsel %vm208_vm14, %v508_v34, %v505_v60  ;;  %v496_v49 = vsel %vm2080_vm7, %v492_v25, %v489_v23  ;;  %v493_v31 = vsel %vm2081_vm8, %v491_v26, %v492_v25  ;;  %vm2083_vm7 = vmmov %vm2082_vm5 }
 0x207   :  { %521 = vrot.lane.b32.xlu0 %v503_v38, %s1371_s4  ;;  %v515_v18 = vsel %vm243_vm2, %v509_v4, 0.0  ;;  %v516_v12 = vsel %vm244_vm3, %v512_v39, 0.0  ;;  %v510_v5 = vsel %vm208_vm14, %v506_v8, %v507_v30  ;;  %v511_v15 = vsel %vm208_vm14, %v505_v60, %v506_v8  ;;  %1258 = vmatpush3.bf16.msra.mxu0 %v1306_v16  ;;  %vm2084_vm8 = vmmov %vm2082_vm5 }
 0x208   :  { %v518_v11 = vpack.c.bf16 %v516_v12, %v515_v18  ;;  %v513_v14 = vsel %vm241_vm1, %v511_v15, 0.0  ;;  %v514_v40 = vsel %vm242_vm4, %v510_v5, 0.0  ;;  %v495_v27 = vsel %vm2079_vm10, %v489_v23, %v490_v24  ;;  %1259 = vmatprep.subr.bf16.mxu0 %v1307_v2 }
 0x209   :  { %v517_v41 = vpack.c.bf16 %v514_v40, %v513_v14  ;;  %v494_v33 = vsel %vm2082_vm5, %v490_v24, %v491_v26  ;;  %v497_v35 = vsel %vm192_vm15, %v496_v49, 0.0  ;;  %v498_v52 = vsel %vm193_vm11, %v495_v27, 0.0 }
 0x20a   :  { %529 = vrot.lane.b32.xlu1 %v518_v11, %s1372_s5  ;;  %v499_v36 = vsel %vm194_vm12, %v494_v33, 0.0  ;;  %v500_v53 = vsel %vm195_vm0, %v493_v31, 0.0  ;;  %v501_v42 = vpack.c.bf16 %v498_v52, %v497_v35  ;;  %vm598_vm10 = vcmask 785408  }
 0x20b   :  { %527 = vrot.lane.b32.xlu0 %v517_v41, %s1372_s5  ;;  %v502_v44 = vpack.c.bf16 %v500_v53, %v499_v36  ;;  %1260 = vmatpush3.bf16.msra.mxu0 %v1307_v2 }
 0x20c   :  { %1273 = vmatprep.subr.bf16.mxu0 %v1308_v43 }
 0x278   :  { %v524_v32 = vpop.permute.xlu1 %523 }
 0x279   :  { %v522_v56 = vpop.permute.xlu0 %521  ;;  %v537_v63 = vsel %vm531_vm13, %v502_v44, %v524_v32 }
 0x27a   :  { %v534_v61 = vsel %vm531_vm13, %v501_v42, %v522_v56 }
 0x27c   :  { %v530_v58 = vpop.permute.xlu1 %529 }
 0x27d   :  { %v528_v62 = vpop.permute.xlu0 %527  ;;  %v542_v0 = vsel %vm538_vm6, %v537_v63, %v530_v58 }
 0x27e   :  { %v540_v47 = vsel %vm538_vm6, %v534_v61, %v528_v62 }
 0x27f   :  { %1245 = vmatprep.mubr.msk.bf16.mxu1 %vm598_vm10, %v540_v47 }
 0x280   :  { %1246 = vmatmul.mubr.msk.bf16.vlgmr.msra.gmra.mrb[0].mxu1 %vm598_vm10, %v542_v0 }
 0x281   :  { %1266 = vmatpush3.bf16.msra.mxu1 %v1309_v45 }
 0x282   :  { %1267 = vmatprep.subr.bf16.mxu1 %v1311_v9 }
 0x285   :  { %1268 = vmatpush3.bf16.msra.mxu1 %v1311_v9 }
 0x353   :  { %v1247_v54 = vpop.f32.mrb[0].mxu1 }
 0x354   :  { %v646_v20 = vadd.f32 %v1247_v54, %v1162_v19  ;;  %v637_v55 = vpop.f32.mrb[1].mxu1 }
 0x355   :  { %v638_v22 = vadd.f32 %v1162_v19, %v637_v55  ;;  %v1248_v1 = vpop.f32.mrb[2].mxu1 }
 0x356   :  { %v654_v60 = vmax.f32 %v646_v20, 0.0  ;;  %v649_v30 = vadd.f32 %v1248_v1, %v1162_v19  ;;  %v640_v34 = vpop.f32.mrb[3].mxu1 }
 0x357   :  { %v652_v7 = vmax.f32 %v638_v22, 0.0  ;;  %v641_v8 = vadd.f32 %v1162_v19, %v640_v34 }
 0x358   :  { %v655_v38 = vmax.f32 %v649_v30, 0.0  ;;  %v658_v4 = vrot.slane %v654_v60, 7  ;;  %v674_v5 = vrot.slane %v654_v60, 1 }
 0x359   :  { %v656_v39 = vrot.slane %v652_v7, 7  ;;  %v672_v18 = vrot.slane %v652_v7, 1  ;;  %v653_v12 = vmax.f32 %v641_v8, 0.0 }
 0x35a   :  { %v659_v15 = vrot.slane %v655_v38, 7  ;;  %v675_v11 = vrot.slane %v655_v38, 1  ;;  %v671_v14 = vpack.c.bf16 %v655_v38, %v654_v60 }
 0x35b   :  { %v657_v40 = vrot.slane %v653_v12, 7  ;;  %v673_v41 = vrot.slane %v653_v12, 1  ;;  %v670_v23 = vpack.c.bf16 %v653_v12, %v652_v7  ;;  %v1185_v12 = vld [vmem:[%s2064_s12] ss:$0 sm:$0xff] }
 0x35c   :  { %690 = vrot.lane.b32.xlu1 %v671_v14, %s1371_s4  ;;  %v676_v25 = vsel %vm208_vm14, %v674_v5, %v675_v11  ;;  %v679_v24 = vsel %vm208_vm14, %v675_v11, %v672_v18  ;;  %v660_v26 = vsel %vm2083_vm7, %v658_v4, %v659_v15  ;;  %v663_v27 = vsel %vm2084_vm8, %v659_v15, %v656_v39 }
 0x35d   :  { %688 = vrot.lane.b32.xlu0 %v670_v23, %s1371_s4  ;;  %v682_v49 = vsel %vm243_vm2, %v676_v25, 0.0  ;;  %v683_v31 = vsel %vm244_vm3, %v679_v24, 0.0  ;;  %v677_v33 = vsel %vm208_vm14, %v673_v41, %v674_v5  ;;  %v678_v32 = vsel %vm208_vm14, %v672_v18, %v673_v41  ;;  %vm2085_vm3 = vmmov %vm2082_vm5 }
 0x35e   :  { %v685_v35 = vpack.c.bf16 %v683_v31, %v682_v49  ;;  %v680_v52 = vsel %vm241_vm1, %v678_v32, 0.0  ;;  %v681_v36 = vsel %vm242_vm4, %v677_v33, 0.0  ;;  %v661_v57 = vsel %vm2082_vm5, %v657_v40, %v658_v4 }
 0x35f   :  { %v684_v53 = vpack.c.bf16 %v681_v36, %v680_v52  ;;  %v666_v37 = vsel %vm194_vm12, %v661_v57, 0.0  ;;  %v667_v56 = vsel %vm195_vm0, %v660_v26, 0.0  ;;  %v662_v42 = vsel %vm2085_vm3, %v656_v39, %v657_v40  ;;  %v1180_v52 = vld [vmem:[%s2062_s10] ss:$0 sm:$0xff] }
 0x360   :  { %696 = vrot.lane.b32.xlu1 %v685_v35, %s1372_s5  ;;  %v669_v51 = vpack.c.bf16 %v667_v56, %v666_v37  ;;  %v664_v50 = vsel %vm192_vm15, %v663_v27, 0.0  ;;  %v665_v44 = vsel %vm193_vm11, %v662_v42, 0.0  ;;  %vm1071_vm14 = vcmask 130112  }
 0x361   :  { %694 = vrot.lane.b32.xlu0 %v684_v53, %s1372_s5  ;;  %v668_v58 = vpack.c.bf16 %v665_v44, %v664_v50  ;;  %vm1082_vm11 = vcmask 1041409   ;;  %vm1086_vm0 = vcmask 123904  }
 0x3ce   :  { %v691_v46 = vpop.permute.xlu1 %690 }
 0x3cf   :  { %v689_v61 = vpop.permute.xlu0 %688  ;;  %v703_v47 = vsel %vm531_vm13, %v669_v51, %v691_v46 }
 0x3d0   :  { %v700_v28 = vsel %vm531_vm13, %v668_v58, %v689_v61 }
 0x3d2   :  { %v697_v62 = vpop.permute.xlu1 %696 }
 0x3d3   :  { %v695_v63 = vpop.permute.xlu0 %694  ;;  %v707_v6 = vsel %vm538_vm6, %v703_v47, %v697_v62 }
 0x3d4   :  { %v705_v0 = vsel %vm538_vm6, %v700_v28, %v695_v63 }
 0x3d5   :  { %1261 = vmatprep.mubr.msk.bf16.mxu0 %vm598_vm10, %v705_v0  ;;  %v1194_v0 = vld [vmem:[%s2065_s13] ss:$0 sm:$0xff] }
 0x3d6   :  { %1262 = vmatmul.mubr.msk.bf16.vlgmr.msra.gmra.mrb[4].mxu0 %vm598_vm10, %v707_v6 }
 0x3d7   :  { %1274 = vmatpush3.bf16.msra.mxu0 %v1308_v43 }
 0x3d8   :  { %1275 = vmatprep.subr.bf16.mxu0 %v1310_v48 }
 0x3db   :  { %1276 = vmatpush3.bf16.msra.mxu0 %v1310_v48 }
 0x4a9   :  { %v1263_v16 = vpop.f32.mrb[4].mxu0 }
 0x4aa   :  { %v810_v2 = vadd.f32 %v1263_v16, %v1171_v13  ;;  %v801_v19 = vpop.f32.mrb[5].mxu0 }
 0x4ab   :  { %v802_v54 = vadd.f32 %v1171_v13, %v801_v19  ;;  %v1264_v20 = vpop.f32.mrb[6].mxu0 }
 0x4ac   :  { %v1968_v55 = vadd.f32 %v810_v2, %v1827_v21  ;;  %v813_v22 = vadd.f32 %v1264_v20, %v1171_v13  ;;  %v804_v1 = vpop.f32.mrb[7].mxu0  ;;  %v1980_v21 = vld [vmem:[%s2066_s14] ss:$0 sm:$0xff] }
 0x4ad   :  { %v1971_v60 = vadd.f32 %v802_v54, %v1829_v3  ;;  %v805_v30 = vadd.f32 %v1171_v13, %v804_v1 }
 0x4ae   :  { %v819_v34 = vadd.f32 %v813_v22, %v1831_v59  ;;  %v822_v8 = vmax.f32 %v1968_v55, 0.0 }
 0x4af   :  { %v817_v7 = vadd.f32 %v805_v30, %v1834_v29  ;;  %v820_v4 = vmax.f32 %v1971_v60, 0.0 }
 0x4b0   :  { %v823_v38 = vmax.f32 %v819_v34, 0.0 }
 0x4b1   :  { %v821_v39 = vmax.f32 %v817_v7, 0.0 }
 0x4b2   :  { %v825_v3 = vpack.c.bf16 %v823_v38, %v822_v8  ;;  %v1985_v18 = vmul.f32 %v1980_v21, %v823_v38  ;;  %v1061_v38 = vand.u32 127, %v71_v10 }
 0x4b3   :  { %v824_v59 = vpack.c.bf16 %v821_v39, %v820_v4  ;;  %v1990_v29 = vmul.f32 %v1980_v21, %v821_v39 }
 0x4b4   :  { %v1066_v39 = vadd.s32 4294967288, %v1061_v38  ;;  %v1051_v55 = vsel %vm531_vm13, %v1985_v18, 0.0 }
 0x4b5   :  { %1269 = vmatprep.mubr.msk.bf16.mxu1 %vm531_vm13, %v824_v59  ;;  %1277 = vmatprep.mubr.msk.bf16.mxu0 %vm531_vm13, %v824_v59 }
 0x4b6   :  { %1270 = vmatmul.mubr.msk.bf16.vlgmr.msra.gmra.mrb[4].mxu1 %vm531_vm13, %v825_v3  ;;  %1278 = vmatmul.mubr.msk.bf16.vlgmr.msra.gmra.mrb[8].mxu0 %vm531_vm13, %v825_v3  ;;  %v1069_v59 = vsub.s32 %v1066_v39, %v1546_v17 }
 0x589   :  { %v1271_v5 = vpop.f32.mrb[4].mxu1  ;;  %v1279_v15 = vpop.f32.mrb[8].mxu0 }
 0x58a   :  { %v974_v11 = vadd.f32 %v1279_v15, %v1185_v12  ;;  %v889_v14 = vpop.f32.mrb[5].mxu1  ;;  %v965_v40 = vpop.f32.mrb[9].mxu0  ;;  %v898_v36 = vadd.f32 %v1271_v5, %v1180_v52  ;;  %v1064_v15 = vsub.s32 %v1061_v38, %v1546_v17 }
 0x58b   :  { %v966_v41 = vadd.f32 %v1185_v12, %v965_v40  ;;  %v1272_v23 = vpop.f32.mrb[6].mxu1  ;;  %v1280_v25 = vpop.f32.mrb[10].mxu0  ;;  %v890_v57 = vadd.f32 %v1180_v52, %v889_v14  ;;  %v1054_v14 = vld [vmem:[%s2054_s2] sm:$0x3]  ;;  %s1373_s2 = smov [#allocation3]  }
 0x58c   :  { %v1192_v24 = vmul.f32 -1.442695, %v974_v11  ;;  %v977_v26 = vadd.f32 %v1280_v25, %v1185_v12  ;;  %v892_v27 = vpop.f32.mrb[7].mxu1  ;;  %v968_v49 = vpop.f32.mrb[11].mxu0  ;;  %v901_v42 = vadd.f32 %v1272_v23, %v1180_v52  ;;  %vm1055_vm15 = vcmp.gt.f32.partialorder %v1054_v14, 0.0  ;;  %s1147_s24 = sshll.u32 %s1373_s2, 4  ;;  %s1148_s24 = int_to_ptr.vmem [resolvable:$true] %s1147_s24 }
 0x58d   :  { %v1190_v31 = vmul.f32 -1.442695, %v966_v41  ;;  %v969_v33 = vadd.f32 %v1185_v12, %v968_v49  ;;  %v893_v44 = vadd.f32 %v1180_v52, %v892_v27  ;;  %v1038_v49 = vmul.f32 %v1980_v21, %v820_v4  ;;  %s1340_s25 = scalar_lea.vmem %s1148_s24, 32  ;;  %p1345_p1 = scmp.lt.s32.totalorder %s1148_s24, %s1148_s24 }
 0x58e   :  { %1312 = vpow2.f32 %v1192_v24  ;;  %v1193_v32 = vmul.f32 -1.442695, %v977_v26  ;;  %v1045_v4 = vsel %vm531_vm13, %v1990_v29, 0.0  ;;  %p1341_p0 = scmp.ne.s32.totalorder %s1148_s24, %s1340_s25  ;;  %p1346_p2 = scmp.lt.s32.totalorder %s1340_s25, %s1340_s25 }
 0x58f   :  { %1314 = vpow2.f32 %v1190_v31  ;;  %v1191_v35 = vmul.f32 -1.442695, %v969_v33  ;;  %v1042_v31 = vsel %vm531_vm13, %v1038_v49, 0.0  ;;  %v1040_v33 = vmul.f32 %v1980_v21, %v822_v8 }
 0x590   :  { %1316 = vpow2.f32 %v1193_v32  ;;  %p1347_p3 = por %p1346_p2, %p1345_p1 }
 0x591   :  { %1318 = vpow2.f32 %v1191_v35  ;;  %v1048_v32 = vsel %vm531_vm13, %v1040_v33, 0.0 }
 0x592   :  { %1320 = vtanh.f32 %v898_v36  ;;  %p1348_p4 = pnand %p1347_p3, %p1341_p0 }
 0x593   :  { %1322 = vtanh.f32 %v890_v57 }
 0x598   :  { %v1313_v53 = vpop.eup %1312 }
 0x599   :  { %v1315_v37 = vpop.eup %1314  ;;  %v994_v56 = vadd.f32 1.0, %v1313_v53 }
 0x59a   :  { %v992_v51 = vadd.f32 1.0, %v1315_v37  ;;  %v1317_v50 = vpop.eup %1316 }
 0x59b   :  { %1324 = vrcp.f32 %v994_v56  ;;  %v995_v58 = vadd.f32 1.0, %v1317_v50  ;;  %v1319_v46 = vpop.eup %1318 }
 0x59c   :  { %1326 = vrcp.f32 %v992_v51  ;;  %v993_v61 = vadd.f32 1.0, %v1319_v46  ;;  %v1321_v62 = vpop.eup %1320 }
 0x59d   :  { %1328 = vtanh.f32 %v901_v42  ;;  %v1323_v28 = vpop.eup %1322 }
 0x59e   :  { %1330 = vrcp.f32 %v995_v58 }
 0x59f   :  { %1332 = vtanh.f32 %v893_v44 }
 0x5a0   :  { %1334 = vrcp.f32 %v993_v61 }
 0x5a5   :  { %v1325_v63 = vpop.eup %1324 }
 0x5a6   :  { %v1327_v47 = vpop.eup %1326  ;;  %v1006_v6 = vmul.f32 %v1325_v63, %v1321_v62 }
 0x5a7   :  { %v1329_v43 = vpop.eup %1328  ;;  %v1004_v45 = vmul.f32 %v1327_v47, %v1323_v28 }
 0x5a8   :  { %v1331_v48 = vpop.eup %1330  ;;  %v1017_v20 = vmul.f32 %v1194_v0, %v1006_v6 }
 0x5a9   :  { %v1333_v9 = vpop.eup %1332  ;;  %v1015_v13 = vmul.f32 %v1194_v0, %v1004_v45  ;;  %v1007_v16 = vmul.f32 %v1331_v48, %v1329_v43 }
 0x5aa   :  { %v1335_v2 = vpop.eup %1334  ;;  %v1025_v30 = vsel %vm390_vm9, %v1017_v20, 0.0 }
 0x5ab   :  { %v1019_v19 = vsel %vm390_vm9, %v1015_v13, 0.0  ;;  %v1005_v54 = vmul.f32 %v1335_v2, %v1333_v9  ;;  %v1018_v34 = vmul.f32 %v1194_v0, %v1007_v16 }
 0x5ac   :  { %1020 = vadd.xlane.f32.xlu0 %v1019_v19 }
 0x5ad   :  { %v1016_v22 = vmul.f32 %v1194_v0, %v1005_v54  ;;  %v1028_v7 = vsel %vm390_vm9, %v1018_v34, 0.0 }
 0x5af   :  { %v1022_v1 = vsel %vm390_vm9, %v1016_v22, 0.0 }
 0x5b0   :  { %1023 = vadd.xlane.f32.xlu1 %v1022_v1  ;;  %1026 = vadd.xlane.f32.xlu0 %v1025_v30 }
 0x5b4   :  { %1029 = vadd.xlane.f32.xlu0 %v1028_v7 }
 0x639   :  { %v1021_v3 = vpop.xlane.xlu0 %1020 }
 0x63a   :  { %v1065_v41 = vrot.slane %v1021_v3, %v1064_v15 }
 0x63d   :  { %v1024_v12 = vpop.xlane.xlu1 %1023  ;;  %v1027_v5 = vpop.xlane.xlu0 %1026 }
 0x63e   :  { %v1070_v11 = vrot.slane %v1024_v12, %v1069_v59  ;;  %v1076_v23 = vrot.slane %v1027_v5, %v1064_v15 }
 0x640   :  { %v1072_v10 = vsel %vm1071_vm14, %v1070_v11, %v1065_v41 }
 0x641   :  { %v1030_v40 = vpop.xlane.xlu0 %1029 }
 0x642   :  { %v1080_v25 = vrot.slane %v1030_v40, %v1069_v59 }
 0x644   :  { %v1081_v24 = vsel %vm1071_vm14, %v1080_v25, %v1076_v23 }
 0x645   :  { %v1083_v26 = vsel %vm1082_vm11, %v1081_v24, %v1072_v10 }
 0x646   :  { %v1085_v17 = vsel %vm1055_vm15, %v1083_v26, -1e+30 }
 0x647   :  { %v1087_v27 = vsel %vm1086_vm0, %v1085_v17, -inf }
 0x648   :  { %1088 = vmax.xlane.f32.xlu1 %v1087_v27 }
 0x64c   :  { %1043 = vadd.xlane.f32.xlu1 %v1042_v31 }
 0x650   :  { %1049 = vadd.xlane.f32.xlu1 %v1048_v32 }
 0x6d5   :  { %v1089_v35 = vpop.xlane.xlu1 %1088 }
 0x6d6   :  { %v1090_v52 = vsub.f32 %v1085_v17, %v1089_v35 }
 0x6d8   :  { %v1091_v36 = vmul.f32 1.442695, %v1090_v52 }
 0x6d9   :  { %v1044_v21 = vpop.xlane.xlu1 %1043 }
 0x6da   :  { %1336 = vpow2.f32 %v1091_v36  ;;  %v1108_v46 = vrot.slane %v1044_v21, %v1064_v15 }
 0x6dd   :  { %v1050_v42 = vpop.xlane.xlu1 %1049 }
 0x6de   :  { %v1117_v44 = vrot.slane %v1050_v42, %v1064_v15 }
 0x6e4   :  { %v1337_v57 = vpop.eup %1336 }
 0x6e5   :  { %v1093_v53 = vmul.f32 %v1337_v57, %v1054_v14 }
 0x6e7   :  { %v1094_v60 = vsel %vm1086_vm0, %v1093_v53, 0.0 }
 0x6e8   :  { %1095 = vadd.xlane.f32.xlu0 %v1094_v60 }
 0x6ec   :  { %1046 = vadd.xlane.f32.xlu0 %v1045_v4 }
 0x6f0   :  { %1052 = vadd.xlane.f32.xlu0 %v1051_v55 }
 0x775   :  { %v1096_v8 = vpop.xlane.xlu0 %1095 }
 0x776   :  { %v1097_v37 = vmax.f32 %v1096_v8, 1e-30 }
 0x778   :  { %1338 = vrcp.f32 %v1097_v37 }
 0x779   :  { %v1047_v56 = vpop.xlane.xlu0 %1046 }
 0x77a   :  { %v1112_v58 = vrot.slane %v1047_v56, %v1069_v59 }
 0x77c   :  { %v1113_v29 = vsel %vm1071_vm14, %v1112_v58, %v1108_v46 }
 0x77d   :  { %v1053_v51 = vpop.xlane.xlu0 %1052 }
 0x77e   :  { %v1121_v50 = vrot.slane %v1053_v51, %v1069_v59 }
 0x780   :  { %v1122_v61 = vsel %vm1071_vm14, %v1121_v50, %v1117_v44 }
 0x781   :  { %v1123_v18 = vsel %vm1082_vm11, %v1122_v61, %v1113_v29 }
 0x782   :  { %v1339_v62 = vpop.eup %1338 }
 0x783   :  { %v1099_v28 = vmul.f32 %v1339_v62, %v1093_v53 }
 0x785   :  { %v1125_v63 = vmul.f32 %v1123_v18, %v1099_v28  ;;  %1100 = vst.msk [vmem:[#allocation3] sm:$0x3] %vm1086_vm0, %v1099_v28 }
 0x787   :  { %v1126_v47 = vsel %vm1086_vm0, %v1125_v63, 0.0 }
 0x788   :  { %1127 = vadd.xlane.f32.xlu1 %v1126_v47 }
 0x789   :  { %1351 = shalt.err (!%p1348_p4)
}
 0x78a   :  { %s1352_s28 = scalar_lea.hbm %s2069_s17, 32 }
 0x78b   :  { %p1353_p5 = scmp.ne.s32.totalorder %s2069_s17, %s1352_s28  ;;  %p1356_p6 = scmp.lt.u32.totalorder %s1352_s28, %s2069_s17 }
 0x78d   :  { %p1358_p7 = pnand %p1356_p6, %p1353_p5 }
 0x78f   :  { %1361 = shalt.err (!%p1358_p7)
}
 0x790   :  { %1150 = dma.vmem_to_hbm [thread:$0]  %s1148_s24, 32, %s2069_s17, [#allocation4]   ;;  %v1196_v0 = vld [vmem:[#allocation2] ss:$0 sm:$0xff]  ;;  %vm1137_vm12 = vcmask 1024  }
 0x815   :  { %v1128_v6 = vpop.xlane.xlu1 %1127 }
 0x816   :  { %v1136_v43 = vadd.f32 %v1196_v0, %v1128_v6 }
 0x818   :  { %1138 = vst.msk [vmem:[%s2068_s16] sm:$0x3] %vm1137_vm12, %v1136_v43 }
 0x819   :  { %1362 = dma.done.wait [#allocation4], 32  }
 0x81a   :  { %1363 = vsyncadd [#allocation4], 4294967264 }
 0x81b   :  { %1156 = vsyncpa [#allocation4], 1 }

</bundles_post_ra>
